<compile_context>
chip_gen: v5e
topology: v5e:2x2
jax: 0.10.0
libtpu: 0.0.40
codegen_flags: <defaults>
</compile_context>

<pallas_src>
import jax
import jax.numpy as jnp
from jax.experimental import pallas as pl
from jax.experimental.pallas import tpu as pltpu


def _gru_chunk_kernel(x_ref, h0_ref, wih_ref, whh_ref, bx_ref, bhn_ref,
                      hseq_ref, hT_ref):
    """One grid step == Tc GRU time steps (PyTorch gate order r, z, n)."""
    c = pl.program_id(1)                                     # time-chunk axis

    @pl.when(c == 0)
    def _():
        # hT block has a constant index over the chunk axis -> VMEM-resident;
        # it *is* the carried hidden state (no extra scratch buffer).
        hT_ref[...] = h0_ref[...]

    Bb, Tc, E = x_ref.shape
    H2 = hT_ref.shape[-1]
    G3 = 3 * H2

    # Hoist weight / bias loads and broadcasts out of the unrolled time loop.
    w_hh = whh_ref[...]                                      # (2H, 3*2H) bf16
    b_hn = jnp.broadcast_to(bhn_ref[...], (Bb, H2))          # (Bb, 2H) f32

    # Hoisted input-path matmul for the WHOLE chunk: one big MXU-efficient
    # matmul, r/z/n biases folded once per chunk.
    x2 = x_ref[...].reshape(Bb * Tc, E)                      # bf16
    gx2 = jnp.dot(x2, wih_ref[...],
                  preferred_element_type=jnp.float32) + bx_ref[...]
    gx_all = gx2.reshape(Bb, Tc, G3)                         # (Bb, Tc, 3*2H) f32

    h = hT_ref[...]                                          # (Bb, 2H) f32 carry
    for t in range(Tc):                                      # fully unrolled, static idx
        # Single fused recurrent matmul per step (1 MXU push on the serial path).
        gh = jnp.dot(h.astype(jnp.bfloat16), w_hh,
                     preferred_element_type=jnp.float32)     # (Bb, 3*2H)
        gx = gx_all[:, t, :]                                 # (Bb, 3*2H)
        r = jax.nn.sigmoid(gx[:, 0:H2] + gh[:, 0:H2])
        z = jax.nn.sigmoid(gx[:, H2:2 * H2] + gh[:, H2:2 * H2])
        n = jnp.tanh(gx[:, 2 * H2:G3] + r * (gh[:, 2 * H2:G3] + b_hn))
        h = (1.0 - z) * n + z * h
        # Lane-dense chunk block: column window [t*2H, (t+1)*2H).
        hseq_ref[:, t * H2:(t + 1) * H2] = h.astype(hseq_ref.dtype)

    # Written every chunk (constant block index) -> correctness never depends
    # on writeback scheduling; only the final value reaches HBM.
    hT_ref[...] = h


def _fc_kernel(h_ref, w_ref, b_ref, o_ref):
    """One logits tile = h tile (tm, 2H) @ W_fc^T tile (2H, tn) + bias tile."""
    o_ref[...] = (jnp.dot(h_ref[...], w_ref[...],
                          preferred_element_type=jnp.float32) + b_ref[...])


def _round_up(x, m):
    return ((x + m - 1) // m) * m


def _pick_time_chunk(T, H2, max_chunk=32):
    """Largest chunk dividing T that keeps x (Tc mult of 8) and the lane-dense
    hseq block (Tc*2H mult of 128) legal; falls back to the whole sequence."""
    if T <= max_chunk:
        return T
    for tc in range(max_chunk - max_chunk % 8, 7, -8):
        if T % tc == 0 and (tc * H2) % 128 == 0:
            return tc
    return T


def decoder_forward(token_seq, hidden_state, params):
    """token_seq: (B, T) int32, hidden_state: (B, 2H) f32
       -> (logits (B, T, V) f32, hidden (1, B, 2H) f32)."""
    emb_table = params["embedding"]          # (V, E)
    w_ih = params["w_ih"]                    # (3*2H, E)   PyTorch layout [r; z; n]
    w_hh = params["w_hh"]                    # (3*2H, 2H)
    b_ih = params["b_ih"]                    # (3*2H,)
    b_hh = params["b_hh"]                    # (3*2H,)
    w_fc = params["w_fc"]                    # (V, 2H)
    b_fc = params["b_fc"]                    # (V,)

    B, T = token_seq.shape
    V, E = emb_table.shape
    H2 = w_hh.shape[1]
    G3 = 3 * H2

    # Embedding gather (glue, plain JAX); batch-first layout kept end to end.
    # TODO(synk): fuse the gather into the GRU kernel via scalar-prefetched
    # token ids + pl.Element row-gather BlockSpec to avoid materializing x.
    x = jnp.take(emb_table, token_seq, axis=0).astype(jnp.bfloat16)    # (B, T, E)

    # Fused gate weights: columns ordered [r | z | n].
    wih_cat = jnp.transpose(w_ih).astype(jnp.bfloat16)                 # (E, 3*2H)
    whh_cat = jnp.transpose(w_hh).astype(jnp.bfloat16)                 # (2H, 3*2H)

    # Biases: [b_ir+b_hr | b_iz+b_hz | b_in] folded into the hoisted input
    # matmul; b_hn kept separate (inside the r* term).
    b_ih3 = b_ih.reshape(3, H2).astype(jnp.float32)
    b_hh3 = b_hh.reshape(3, H2).astype(jnp.float32)
    bx = jnp.concatenate([b_ih3[0] + b_hh3[0],
                          b_ih3[1] + b_hh3[1],
                          b_ih3[2]], axis=0).reshape(1, G3)
    bhn = b_hh3[2].reshape(1, H2)

    h0 = hidden_state.astype(jnp.float32)                              # (B, 2H)

    Tc = _pick_time_chunk(T, H2)
    n_chunks = T // Tc

    # v7x megacore: the time axis is serial, so batch is the only recurrence
    # parallelism. Split batch into 2 "parallel" blocks when lane/sublane-clean.
    n_b = 2 if (B % 16 == 0) else 1
    Bb = B // n_b

    # Explicit VMEM budget (double-buffered x/hseq chunks + resident weights),
    # clamped to [32 MiB, 64 MiB] so it is safe on v5e/v6e/v7x alike.
    chunk_bytes = Bb * Tc * (E + H2) * 2
    weight_bytes = (E + H2) * G3 * 2
    vmem_limit = int(min(64 * 1024 * 1024,
                         max(32 * 1024 * 1024, 4 * (chunk_bytes + weight_bytes))))

    # ---- Kernel 1: GRU recurrence over (batch blocks x time chunks) -------
    hseq, hT = pl.pallas_call(
        _gru_chunk_kernel,
        out_shape=(
            jax.ShapeDtypeStruct((B, T * H2), jnp.bfloat16),  # lane-dense h_t sequence
            jax.ShapeDtypeStruct((B, H2), jnp.float32),       # final hidden
        ),
        grid_spec=pltpu.PrefetchScalarGridSpec(
            num_scalar_prefetch=0,
            grid=(n_b, n_chunks),
            in_specs=[
                pl.BlockSpec((Bb, Tc, E), lambda b, c: (b, c, 0)),   # x chunk
                pl.BlockSpec((Bb, H2), lambda b, c: (b, 0)),         # h0
                pl.BlockSpec((E, G3), lambda b, c: (0, 0)),          # W_ih fused
                pl.BlockSpec((H2, G3), lambda b, c: (0, 0)),         # W_hh fused
                pl.BlockSpec((1, G3), lambda b, c: (0, 0)),          # folded r/z/n bias
                pl.BlockSpec((1, H2), lambda b, c: (0, 0)),          # b_hn
            ],
            out_specs=[
                pl.BlockSpec((Bb, Tc * H2), lambda b, c: (b, c)),    # h_t sequence
                pl.BlockSpec((Bb, H2), lambda b, c: (b, 0)),         # h_T (carried state)
            ],
        ),
        compiler_params=pltpu.CompilerParams(
            dimension_semantics=("parallel", "arbitrary"),
            vmem_limit_bytes=vmem_limit,
        ),
    )(x, h0, wih_cat, whh_cat, bx, bhn)

    # ---- Kernel 2: vocab projection hoisted out of the recurrence ---------
    M = B * T
    h2d = hseq.reshape(M, H2)                                 # bf16, same element order
    wfc_T = jnp.transpose(w_fc).astype(jnp.bfloat16)          # (2H, V)
    bfc2 = b_fc.reshape(1, V).astype(jnp.float32)

    # cdiv-style padded grid: no exact-divisor fallback to tiny or giant tiles.
    tn = min(1024, _round_up(V, 128))
    V_pad = _round_up(V, tn)
    tm = min(512, _round_up(M, 8))
    M_pad = _round_up(M, tm)

    if M_pad != M:
        h2d = jnp.pad(h2d, ((0, M_pad - M), (0, 0)))
    if V_pad != V:
        wfc_T = jnp.pad(wfc_T, ((0, 0), (0, V_pad - V)))
        bfc2 = jnp.pad(bfc2, ((0, 0), (0, V_pad - V)))

    logits2d = pl.pallas_call(
        _fc_kernel,
        out_shape=jax.ShapeDtypeStruct((M_pad, V_pad), jnp.float32),
        grid_spec=pltpu.PrefetchScalarGridSpec(
            num_scalar_prefetch=0,
            grid=(M_pad // tm, V_pad // tn),
            in_specs=[
                pl.BlockSpec((tm, H2), lambda i, j: (i, 0)),   # h rows
                pl.BlockSpec((H2, tn), lambda i, j: (0, j)),   # W_fc^T vocab tile
                pl.BlockSpec((1, tn), lambda i, j: (0, j)),    # b_fc vocab tile
            ],
            out_specs=pl.BlockSpec((tm, tn), lambda i, j: (i, j)),
        ),
        compiler_params=pltpu.CompilerParams(
            dimension_semantics=("parallel", "parallel"),
        ),
    )(h2d, wfc_T, bfc2)

    logits = logits2d[:M, :V].reshape(B, T, V)                 # batch-first
    hidden = hT[None]                                          # (1, B, 2H) like nn.GRU
    return logits, hidden


def init_params(key, input_dim, emb_dim, hidden_dim):
    H2 = hidden_dim * 2
    ks = jax.random.split(key, 7)
    scale = 0.1
    return {
        "embedding": scale * jax.random.normal(ks[0], (input_dim, emb_dim), jnp.float32),
        "w_ih": scale * jax.random.normal(ks[1], (3 * H2, emb_dim), jnp.float32),
        "w_hh": scale * jax.random.normal(ks[2], (3 * H2, H2), jnp.float32),
        "b_ih": scale * jax.random.normal(ks[3], (3 * H2,), jnp.float32),
        "b_hh": scale * jax.random.normal(ks[4], (3 * H2,), jnp.float32),
        "w_fc": scale * jax.random.normal(ks[5], (input_dim, H2), jnp.float32),
        "b_fc": scale * jax.random.normal(ks[6], (input_dim,), jnp.float32),
    }


def _reference_forward(token_seq, hidden_state, params):
    """Pure-JAX f32 reference matching torch Embedding -> GRU -> Linear."""
    emb = params["embedding"][token_seq]                      # (B, T, E)
    H2 = params["w_hh"].shape[1]
    w_ih, w_hh = params["w_ih"], params["w_hh"]
    b_ih, b_hh = params["b_ih"], params["b_hh"]

    def step(h, x_t):
        gx = x_t @ w_ih.T + b_ih
        gh = h @ w_hh.T + b_hh
        r = jax.nn.sigmoid(gx[:, :H2] + gh[:, :H2])
        z = jax.nn.sigmoid(gx[:, H2:2 * H2] + gh[:, H2:2 * H2])
        n = jnp.tanh(gx[:, 2 * H2:] + r * gh[:, 2 * H2:])
        h_new = (1.0 - z) * n + z * h
        return h_new, h_new

    hT, hs = jax.lax.scan(step, hidden_state, jnp.transpose(emb, (1, 0, 2)))
    hs = jnp.transpose(hs, (1, 0, 2))                         # (B, T, 2H)
    logits = hs @ params["w_fc"].T + params["b_fc"]
    return logits, hT[None]


if __name__ == "__main__":
    # Small shapes consistent with the module.
    input_dim = 16     # vocab size
    emb_dim = 32
    hidden_dim = 16    # GRU hidden = 2 * hidden_dim = 32
    B, T = 2, 8

    # Note: nn.GRU dropout has no effect with a single layer; nothing to emulate.
    key = jax.random.PRNGKey(0)
    pkey, tkey, hkey = jax.random.split(key, 3)
    params = init_params(pkey, input_dim, emb_dim, hidden_dim)

    token_seq = jax.random.randint(tkey, (B, T), 0, input_dim, dtype=jnp.int32)
    hidden_state = jax.random.normal(hkey, (B, hidden_dim * 2), jnp.float32)

    logits, hidden = decoder_forward(token_seq, hidden_state, params)
    jax.block_until_ready((logits, hidden))

    assert logits.shape == (B, T, input_dim)
    assert hidden.shape == (1, B, hidden_dim * 2)

    ref_logits, ref_hidden = _reference_forward(token_seq, hidden_state, params)
    assert jnp.allclose(logits, ref_logits, atol=5e-2, rtol=5e-2)
    assert jnp.allclose(hidden, ref_hidden, atol=5e-2, rtol=5e-2)

    print("KERNEL_OK")
</pallas_src>

<mosaic_0001>
module attributes {stable_mosaic.version = 11 : i64} {
  func.func @_gru_chunk_kernel(%arg0: i32, %arg1: i32, %arg2: memref<2x8x32xbf16, #tpu.memory_space<vmem>>, %arg3: memref<2x32xf32, #tpu.memory_space<vmem>>, %arg4: memref<32x96xbf16, #tpu.memory_space<vmem>>, %arg5: memref<32x96xbf16, #tpu.memory_space<vmem>>, %arg6: memref<1x96xf32, #tpu.memory_space<vmem>>, %arg7: memref<1x32xf32, #tpu.memory_space<vmem>>, %arg8: memref<2x256xbf16, #tpu.memory_space<vmem>>, %arg9: memref<2x32xf32, #tpu.memory_space<vmem>>) attributes {dimension_semantics = [#tpu.dimension_semantics<parallel>, #tpu.dimension_semantics<arbitrary>], iteration_bounds = array<i64: 1, 1>, scalar_prefetch = 0 : i64, scratch_operands = 0 : i64, tpu.core_type = #tpu.core_type<tc>, window_params = [{transform_indices = @transform_0, window_bounds = array<i64: 2, 8, 32>}, {transform_indices = @transform_1, window_bounds = array<i64: 2, 32>}, {pipeline_mode = #tpu.pipeline_mode<synchronous>, transform_indices = @transform_2, window_bounds = array<i64: 32, 96>}, {pipeline_mode = #tpu.pipeline_mode<synchronous>, transform_indices = @transform_3, window_bounds = array<i64: 32, 96>}, {pipeline_mode = #tpu.pipeline_mode<synchronous>, transform_indices = @transform_4, window_bounds = array<i64: 1, 96>}, {pipeline_mode = #tpu.pipeline_mode<synchronous>, transform_indices = @transform_5, window_bounds = array<i64: 1, 32>}, {transform_indices = @transform_6, window_bounds = array<i64: 2, 256>}, {transform_indices = @transform_7, window_bounds = array<i64: 2, 32>}]} {
    %c0_i32 = arith.constant 0 : i32
    %0 = arith.cmpi eq, %arg1, %c0_i32 : i32
    %1 = arith.extui %0 : i1 to i32
    %c0_i32_0 = arith.constant 0 : i32
    %2 = arith.cmpi ne, %1, %c0_i32_0 : i32
    scf.if %2 {
      %c0_56 = arith.constant 0 : index
      %c0_57 = arith.constant 0 : index
      %281 = vector.load %arg3[%c0_56, %c0_57] : memref<2x32xf32, #tpu.memory_space<vmem>>, vector<2x32xf32>
      %c0_58 = arith.constant 0 : index
      %c0_59 = arith.constant 0 : index
      %282 = vector.load %arg9[%c0_58, %c0_59] : memref<2x32xf32, #tpu.memory_space<vmem>>, vector<2x32xf32>
      tpu.vector_store %arg9[%c0_58, %c0_59], %281 {strides = array<i32>} : memref<2x32xf32, #tpu.memory_space<vmem>>, vector<2x32xf32>,
    } else {
    }
    %c0 = arith.constant 0 : index
    %c0_1 = arith.constant 0 : index
    %3 = vector.load %arg5[%c0, %c0_1] : memref<32x96xbf16, #tpu.memory_space<vmem>>, vector<32x96xbf16>
    %c0_2 = arith.constant 0 : index
    %c0_3 = arith.constant 0 : index
    %4 = vector.load %arg7[%c0_2, %c0_3] : memref<1x32xf32, #tpu.memory_space<vmem>>, vector<1x32xf32>
    %5 = vector.shape_cast %4 : vector<1x32xf32> to vector<1x32xf32>
    %6 = vector.broadcast %5 : vector<1x32xf32> to vector<2x32xf32>
    %c0_4 = arith.constant 0 : index
    %c0_5 = arith.constant 0 : index
    %c0_6 = arith.constant 0 : index
    %7 = vector.load %arg2[%c0_4, %c0_5, %c0_6] : memref<2x8x32xbf16, #tpu.memory_space<vmem>>, vector<2x8x32xbf16>
    %8 = vector.shape_cast %7 : vector<2x8x32xbf16> to vector<16x32xbf16>
    %c0_7 = arith.constant 0 : index
    %c0_8 = arith.constant 0 : index
    %9 = vector.load %arg4[%c0_7, %c0_8] : memref<32x96xbf16, #tpu.memory_space<vmem>>, vector<32x96xbf16>
    %cst = arith.constant dense<0.000000e+00> : vector<16x96xf32>
    %10 = tpu.matmul %8, %9, %cst {dimension_numbers = #tpu.dot_dimension_numbers<[1], [0], [0], [1], [0, 0, 1, 1], [], []>} : vector<16x32xbf16>, vector<32x96xbf16>, vector<16x96xf32> -> vector<16x96xf32>
    %c0_9 = arith.constant 0 : index
    %c0_10 = arith.constant 0 : index
    %11 = vector.load %arg6[%c0_9, %c0_10] : memref<1x96xf32, #tpu.memory_space<vmem>>, vector<1x96xf32>
    %12 = vector.broadcast %11 : vector<1x96xf32> to vector<16x96xf32>
    %13 = arith.addf %10, %12 : vector<16x96xf32>
    %14 = vector.shape_cast %13 : vector<16x96xf32> to vector<2x8x96xf32>
    %c0_11 = arith.constant 0 : index
    %c0_12 = arith.constant 0 : index
    %15 = vector.load %arg9[%c0_11, %c0_12] : memref<2x32xf32, #tpu.memory_space<vmem>>, vector<2x32xf32>
    %16 = arith.truncf %15 : vector<2x32xf32> to vector<2x32xbf16>
    %cst_13 = arith.constant dense<0.000000e+00> : vector<2x96xf32>
    %17 = tpu.matmul %16, %3, %cst_13 {dimension_numbers = #tpu.dot_dimension_numbers<[1], [0], [0], [1], [0, 0, 1, 1], [], []>} : vector<2x32xbf16>, vector<32x96xbf16>, vector<2x96xf32> -> vector<2x96xf32>
    %18 = vector.extract_strided_slice %14 {offsets = [0, 0, 0], sizes = [2, 1, 96], strides = [1, 1, 1]} : vector<2x8x96xf32> to vector<2x1x96xf32>
    %19 = vector.shape_cast %18 : vector<2x1x96xf32> to vector<2x96xf32>
    %20 = vector.extract_strided_slice %19 {offsets = [0, 0], sizes = [2, 32], strides = [1, 1]} : vector<2x96xf32> to vector<2x32xf32>
    %21 = vector.extract_strided_slice %17 {offsets = [0, 0], sizes = [2, 32], strides = [1, 1]} : vector<2x96xf32> to vector<2x32xf32>
    %22 = arith.addf %20, %21 : vector<2x32xf32>
    %23 = arith.negf %22 : vector<2x32xf32>
    %24 = math.exp %23 : vector<2x32xf32>
    %cst_14 = arith.constant 1.000000e+00 : f32
    %25 = vector.broadcast %cst_14 : f32 to vector<2x32xf32>
    %26 = arith.addf %25, %24 : vector<2x32xf32>
    %27 = arith.divf %25, %26 : vector<2x32xf32>
    %28 = vector.extract_strided_slice %19 {offsets = [0, 32], sizes = [2, 32], strides = [1, 1]} : vector<2x96xf32> to vector<2x32xf32>
    %29 = vector.extract_strided_slice %17 {offsets = [0, 32], sizes = [2, 32], strides = [1, 1]} : vector<2x96xf32> to vector<2x32xf32>
    %30 = arith.addf %28, %29 : vector<2x32xf32>
    %31 = arith.negf %30 : vector<2x32xf32>
    %32 = math.exp %31 : vector<2x32xf32>
    %cst_15 = arith.constant 1.000000e+00 : f32
    %33 = vector.broadcast %cst_15 : f32 to vector<2x32xf32>
    %34 = arith.addf %33, %32 : vector<2x32xf32>
    %35 = arith.divf %33, %34 : vector<2x32xf32>
    %36 = vector.extract_strided_slice %19 {offsets = [0, 64], sizes = [2, 32], strides = [1, 1]} : vector<2x96xf32> to vector<2x32xf32>
    %37 = vector.extract_strided_slice %17 {offsets = [0, 64], sizes = [2, 32], strides = [1, 1]} : vector<2x96xf32> to vector<2x32xf32>
    %38 = arith.addf %37, %6 : vector<2x32xf32>
    %39 = arith.mulf %27, %38 : vector<2x32xf32>
    %40 = arith.addf %36, %39 : vector<2x32xf32>
    %41 = math.tanh %40 : vector<2x32xf32>
    %cst_16 = arith.constant 1.000000e+00 : f32
    %42 = vector.broadcast %cst_16 : f32 to vector<2x32xf32>
    %43 = arith.subf %42, %35 : vector<2x32xf32>
    %44 = arith.mulf %43, %41 : vector<2x32xf32>
    %45 = arith.mulf %35, %15 : vector<2x32xf32>
    %46 = arith.addf %44, %45 : vector<2x32xf32>
    %47 = arith.truncf %46 : vector<2x32xf32> to vector<2x32xbf16>
    %c0_17 = arith.constant 0 : index
    %c0_18 = arith.constant 0 : index
    %48 = vector.load %arg8[%c0_17, %c0_18] : memref<2x256xbf16, #tpu.memory_space<vmem>>, vector<2x32xbf16>
    tpu.vector_store %arg8[%c0_17, %c0_18], %47 {strides = array<i32>} : memref<2x256xbf16, #tpu.memory_space<vmem>>, vector<2x32xbf16>,
    %49 = arith.truncf %46 : vector<2x32xf32> to vector<2x32xbf16>
    %cst_19 = arith.constant dense<0.000000e+00> : vector<2x96xf32>
    %50 = tpu.matmul %49, %3, %cst_19 {dimension_numbers = #tpu.dot_dimension_numbers<[1], [0], [0], [1], [0, 0, 1, 1], [], []>} : vector<2x32xbf16>, vector<32x96xbf16>, vector<2x96xf32> -> vector<2x96xf32>
    %51 = vector.extract_strided_slice %14 {offsets = [0, 1, 0], sizes = [2, 1, 96], strides = [1, 1, 1]} : vector<2x8x96xf32> to vector<2x1x96xf32>
    %52 = vector.shape_cast %51 : vector<2x1x96xf32> to vector<2x96xf32>
    %53 = vector.extract_strided_slice %52 {offsets = [0, 0], sizes = [2, 32], strides = [1, 1]} : vector<2x96xf32> to vector<2x32xf32>
    %54 = vector.extract_strided_slice %50 {offsets = [0, 0], sizes = [2, 32], strides = [1, 1]} : vector<2x96xf32> to vector<2x32xf32>
    %55 = arith.addf %53, %54 : vector<2x32xf32>
    %56 = arith.negf %55 : vector<2x32xf32>
    %57 = math.exp %56 : vector<2x32xf32>
    %cst_20 = arith.constant 1.000000e+00 : f32
    %58 = vector.broadcast %cst_20 : f32 to vector<2x32xf32>
    %59 = arith.addf %58, %57 : vector<2x32xf32>
    %60 = arith.divf %58, %59 : vector<2x32xf32>
    %61 = vector.extract_strided_slice %52 {offsets = [0, 32], sizes = [2, 32], strides = [1, 1]} : vector<2x96xf32> to vector<2x32xf32>
    %62 = vector.extract_strided_slice %50 {offsets = [0, 32], sizes = [2, 32], strides = [1, 1]} : vector<2x96xf32> to vector<2x32xf32>
    %63 = arith.addf %61, %62 : vector<2x32xf32>
    %64 = arith.negf %63 : vector<2x32xf32>
    %65 = math.exp %64 : vector<2x32xf32>
    %cst_21 = arith.constant 1.000000e+00 : f32
    %66 = vector.broadcast %cst_21 : f32 to vector<2x32xf32>
    %67 = arith.addf %66, %65 : vector<2x32xf32>
    %68 = arith.divf %66, %67 : vector<2x32xf32>
    %69 = vector.extract_strided_slice %52 {offsets = [0, 64], sizes = [2, 32], strides = [1, 1]} : vector<2x96xf32> to vector<2x32xf32>
    %70 = vector.extract_strided_slice %50 {offsets = [0, 64], sizes = [2, 32], strides = [1, 1]} : vector<2x96xf32> to vector<2x32xf32>
    %71 = arith.addf %70, %6 : vector<2x32xf32>
    %72 = arith.mulf %60, %71 : vector<2x32xf32>
    %73 = arith.addf %69, %72 : vector<2x32xf32>
    %74 = math.tanh %73 : vector<2x32xf32>
    %cst_22 = arith.constant 1.000000e+00 : f32
    %75 = vector.broadcast %cst_22 : f32 to vector<2x32xf32>
    %76 = arith.subf %75, %68 : vector<2x32xf32>
    %77 = arith.mulf %76, %74 : vector<2x32xf32>
    %78 = arith.mulf %68, %46 : vector<2x32xf32>
    %79 = arith.addf %77, %78 : vector<2x32xf32>
    %80 = arith.truncf %79 : vector<2x32xf32> to vector<2x32xbf16>
    %c0_23 = arith.constant 0 : index
    %c32 = arith.constant 32 : index
    %81 = vector.load %arg8[%c0_23, %c32] : memref<2x256xbf16, #tpu.memory_space<vmem>>, vector<2x32xbf16>
    tpu.vector_store %arg8[%c0_23, %c32], %80 {strides = array<i32>} : memref<2x256xbf16, #tpu.memory_space<vmem>>, vector<2x32xbf16>,
    %82 = arith.truncf %79 : vector<2x32xf32> to vector<2x32xbf16>
    %cst_24 = arith.constant dense<0.000000e+00> : vector<2x96xf32>
    %83 = tpu.matmul %82, %3, %cst_24 {dimension_numbers = #tpu.dot_dimension_numbers<[1], [0], [0], [1], [0, 0, 1, 1], [], []>} : vector<2x32xbf16>, vector<32x96xbf16>, vector<2x96xf32> -> vector<2x96xf32>
    %84 = vector.extract_strided_slice %14 {offsets = [0, 2, 0], sizes = [2, 1, 96], strides = [1, 1, 1]} : vector<2x8x96xf32> to vector<2x1x96xf32>
    %85 = vector.shape_cast %84 : vector<2x1x96xf32> to vector<2x96xf32>
    %86 = vector.extract_strided_slice %85 {offsets = [0, 0], sizes = [2, 32], strides = [1, 1]} : vector<2x96xf32> to vector<2x32xf32>
    %87 = vector.extract_strided_slice %83 {offsets = [0, 0], sizes = [2, 32], strides = [1, 1]} : vector<2x96xf32> to vector<2x32xf32>
    %88 = arith.addf %86, %87 : vector<2x32xf32>
    %89 = arith.negf %88 : vector<2x32xf32>
    %90 = math.exp %89 : vector<2x32xf32>
    %cst_25 = arith.constant 1.000000e+00 : f32
    %91 = vector.broadcast %cst_25 : f32 to vector<2x32xf32>
    %92 = arith.addf %91, %90 : vector<2x32xf32>
    %93 = arith.divf %91, %92 : vector<2x32xf32>
    %94 = vector.extract_strided_slice %85 {offsets = [0, 32], sizes = [2, 32], strides = [1, 1]} : vector<2x96xf32> to vector<2x32xf32>
    %95 = vector.extract_strided_slice %83 {offsets = [0, 32], sizes = [2, 32], strides = [1, 1]} : vector<2x96xf32> to vector<2x32xf32>
    %96 = arith.addf %94, %95 : vector<2x32xf32>
    %97 = arith.negf %96 : vector<2x32xf32>
    %98 = math.exp %97 : vector<2x32xf32>
    %cst_26 = arith.constant 1.000000e+00 : f32
    %99 = vector.broadcast %cst_26 : f32 to vector<2x32xf32>
    %100 = arith.addf %99, %98 : vector<2x32xf32>
    %101 = arith.divf %99, %100 : vector<2x32xf32>
    %102 = vector.extract_strided_slice %85 {offsets = [0, 64], sizes = [2, 32], strides = [1, 1]} : vector<2x96xf32> to vector<2x32xf32>
    %103 = vector.extract_strided_slice %83 {offsets = [0, 64], sizes = [2, 32], strides = [1, 1]} : vector<2x96xf32> to vector<2x32xf32>
    %104 = arith.addf %103, %6 : vector<2x32xf32>
    %105 = arith.mulf %93, %104 : vector<2x32xf32>
    %106 = arith.addf %102, %105 : vector<2x32xf32>
    %107 = math.tanh %106 : vector<2x32xf32>
    %cst_27 = arith.constant 1.000000e+00 : f32
    %108 = vector.broadcast %cst_27 : f32 to vector<2x32xf32>
    %109 = arith.subf %108, %101 : vector<2x32xf32>
    %110 = arith.mulf %109, %107 : vector<2x32xf32>
    %111 = arith.mulf %101, %79 : vector<2x32xf32>
    %112 = arith.addf %110, %111 : vector<2x32xf32>
    %113 = arith.truncf %112 : vector<2x32xf32> to vector<2x32xbf16>
    %c0_28 = arith.constant 0 : index
    %c64 = arith.constant 64 : index
    %114 = vector.load %arg8[%c0_28, %c64] : memref<2x256xbf16, #tpu.memory_space<vmem>>, vector<2x32xbf16>
    tpu.vector_store %arg8[%c0_28, %c64], %113 {strides = array<i32>} : memref<2x256xbf16, #tpu.memory_space<vmem>>, vector<2x32xbf16>,
    %115 = arith.truncf %112 : vector<2x32xf32> to vector<2x32xbf16>
    %cst_29 = arith.constant dense<0.000000e+00> : vector<2x96xf32>
    %116 = tpu.matmul %115, %3, %cst_29 {dimension_numbers = #tpu.dot_dimension_numbers<[1], [0], [0], [1], [0, 0, 1, 1], [], []>} : vector<2x32xbf16>, vector<32x96xbf16>, vector<2x96xf32> -> vector<2x96xf32>
    %117 = vector.extract_strided_slice %14 {offsets = [0, 3, 0], sizes = [2, 1, 96], strides = [1, 1, 1]} : vector<2x8x96xf32> to vector<2x1x96xf32>
    %118 = vector.shape_cast %117 : vector<2x1x96xf32> to vector<2x96xf32>
    %119 = vector.extract_strided_slice %118 {offsets = [0, 0], sizes = [2, 32], strides = [1, 1]} : vector<2x96xf32> to vector<2x32xf32>
    %120 = vector.extract_strided_slice %116 {offsets = [0, 0], sizes = [2, 32], strides = [1, 1]} : vector<2x96xf32> to vector<2x32xf32>
    %121 = arith.addf %119, %120 : vector<2x32xf32>
    %122 = arith.negf %121 : vector<2x32xf32>
    %123 = math.exp %122 : vector<2x32xf32>
    %cst_30 = arith.constant 1.000000e+00 : f32
    %124 = vector.broadcast %cst_30 : f32 to vector<2x32xf32>
    %125 = arith.addf %124, %123 : vector<2x32xf32>
    %126 = arith.divf %124, %125 : vector<2x32xf32>
    %127 = vector.extract_strided_slice %118 {offsets = [0, 32], sizes = [2, 32], strides = [1, 1]} : vector<2x96xf32> to vector<2x32xf32>
    %128 = vector.extract_strided_slice %116 {offsets = [0, 32], sizes = [2, 32], strides = [1, 1]} : vector<2x96xf32> to vector<2x32xf32>
    %129 = arith.addf %127, %128 : vector<2x32xf32>
    %130 = arith.negf %129 : vector<2x32xf32>
    %131 = math.exp %130 : vector<2x32xf32>
    %cst_31 = arith.constant 1.000000e+00 : f32
    %132 = vector.broadcast %cst_31 : f32 to vector<2x32xf32>
    %133 = arith.addf %132, %131 : vector<2x32xf32>
    %134 = arith.divf %132, %133 : vector<2x32xf32>
    %135 = vector.extract_strided_slice %118 {offsets = [0, 64], sizes = [2, 32], strides = [1, 1]} : vector<2x96xf32> to vector<2x32xf32>
    %136 = vector.extract_strided_slice %116 {offsets = [0, 64], sizes = [2, 32], strides = [1, 1]} : vector<2x96xf32> to vector<2x32xf32>
    %137 = arith.addf %136, %6 : vector<2x32xf32>
    %138 = arith.mulf %126, %137 : vector<2x32xf32>
    %139 = arith.addf %135, %138 : vector<2x32xf32>
    %140 = math.tanh %139 : vector<2x32xf32>
    %cst_32 = arith.constant 1.000000e+00 : f32
    %141 = vector.broadcast %cst_32 : f32 to vector<2x32xf32>
    %142 = arith.subf %141, %134 : vector<2x32xf32>
    %143 = arith.mulf %142, %140 : vector<2x32xf32>
    %144 = arith.mulf %134, %112 : vector<2x32xf32>
    %145 = arith.addf %143, %144 : vector<2x32xf32>
    %146 = arith.truncf %145 : vector<2x32xf32> to vector<2x32xbf16>
    %c0_33 = arith.constant 0 : index
    %c96 = arith.constant 96 : index
    %147 = vector.load %arg8[%c0_33, %c96] : memref<2x256xbf16, #tpu.memory_space<vmem>>, vector<2x32xbf16>
    tpu.vector_store %arg8[%c0_33, %c96], %146 {strides = array<i32>} : memref<2x256xbf16, #tpu.memory_space<vmem>>, vector<2x32xbf16>,
    %148 = arith.truncf %145 : vector<2x32xf32> to vector<2x32xbf16>
    %cst_34 = arith.constant dense<0.000000e+00> : vector<2x96xf32>
    %149 = tpu.matmul %148, %3, %cst_34 {dimension_numbers = #tpu.dot_dimension_numbers<[1], [0], [0], [1], [0, 0, 1, 1], [], []>} : vector<2x32xbf16>, vector<32x96xbf16>, vector<2x96xf32> -> vector<2x96xf32>
    %150 = vector.extract_strided_slice %14 {offsets = [0, 4, 0], sizes = [2, 1, 96], strides = [1, 1, 1]} : vector<2x8x96xf32> to vector<2x1x96xf32>
    %151 = vector.shape_cast %150 : vector<2x1x96xf32> to vector<2x96xf32>
    %152 = vector.extract_strided_slice %151 {offsets = [0, 0], sizes = [2, 32], strides = [1, 1]} : vector<2x96xf32> to vector<2x32xf32>
    %153 = vector.extract_strided_slice %149 {offsets = [0, 0], sizes = [2, 32], strides = [1, 1]} : vector<2x96xf32> to vector<2x32xf32>
    %154 = arith.addf %152, %153 : vector<2x32xf32>
    %155 = arith.negf %154 : vector<2x32xf32>
    %156 = math.exp %155 : vector<2x32xf32>
    %cst_35 = arith.constant 1.000000e+00 : f32
    %157 = vector.broadcast %cst_35 : f32 to vector<2x32xf32>
    %158 = arith.addf %157, %156 : vector<2x32xf32>
    %159 = arith.divf %157, %158 : vector<2x32xf32>
    %160 = vector.extract_strided_slice %151 {offsets = [0, 32], sizes = [2, 32], strides = [1, 1]} : vector<2x96xf32> to vector<2x32xf32>
    %161 = vector.extract_strided_slice %149 {offsets = [0, 32], sizes = [2, 32], strides = [1, 1]} : vector<2x96xf32> to vector<2x32xf32>
    %162 = arith.addf %160, %161 : vector<2x32xf32>
    %163 = arith.negf %162 : vector<2x32xf32>
    %164 = math.exp %163 : vector<2x32xf32>
    %cst_36 = arith.constant 1.000000e+00 : f32
    %165 = vector.broadcast %cst_36 : f32 to vector<2x32xf32>
    %166 = arith.addf %165, %164 : vector<2x32xf32>
    %167 = arith.divf %165, %166 : vector<2x32xf32>
    %168 = vector.extract_strided_slice %151 {offsets = [0, 64], sizes = [2, 32], strides = [1, 1]} : vector<2x96xf32> to vector<2x32xf32>
    %169 = vector.extract_strided_slice %149 {offsets = [0, 64], sizes = [2, 32], strides = [1, 1]} : vector<2x96xf32> to vector<2x32xf32>
    %170 = arith.addf %169, %6 : vector<2x32xf32>
    %171 = arith.mulf %159, %170 : vector<2x32xf32>
    %172 = arith.addf %168, %171 : vector<2x32xf32>
    %173 = math.tanh %172 : vector<2x32xf32>
    %cst_37 = arith.constant 1.000000e+00 : f32
    %174 = vector.broadcast %cst_37 : f32 to vector<2x32xf32>
    %175 = arith.subf %174, %167 : vector<2x32xf32>
    %176 = arith.mulf %175, %173 : vector<2x32xf32>
    %177 = arith.mulf %167, %145 : vector<2x32xf32>
    %178 = arith.addf %176, %177 : vector<2x32xf32>
    %179 = arith.truncf %178 : vector<2x32xf32> to vector<2x32xbf16>
    %c0_38 = arith.constant 0 : index
    %c128 = arith.constant 128 : index
    %180 = vector.load %arg8[%c0_38, %c128] : memref<2x256xbf16, #tpu.memory_space<vmem>>, vector<2x32xbf16>
    tpu.vector_store %arg8[%c0_38, %c128], %179 {strides = array<i32>} : memref<2x256xbf16, #tpu.memory_space<vmem>>, vector<2x32xbf16>,
    %181 = arith.truncf %178 : vector<2x32xf32> to vector<2x32xbf16>
    %cst_39 = arith.constant dense<0.000000e+00> : vector<2x96xf32>
    %182 = tpu.matmul %181, %3, %cst_39 {dimension_numbers = #tpu.dot_dimension_numbers<[1], [0], [0], [1], [0, 0, 1, 1], [], []>} : vector<2x32xbf16>, vector<32x96xbf16>, vector<2x96xf32> -> vector<2x96xf32>
    %183 = vector.extract_strided_slice %14 {offsets = [0, 5, 0], sizes = [2, 1, 96], strides = [1, 1, 1]} : vector<2x8x96xf32> to vector<2x1x96xf32>
    %184 = vector.shape_cast %183 : vector<2x1x96xf32> to vector<2x96xf32>
    %185 = vector.extract_strided_slice %184 {offsets = [0, 0], sizes = [2, 32], strides = [1, 1]} : vector<2x96xf32> to vector<2x32xf32>
    %186 = vector.extract_strided_slice %182 {offsets = [0, 0], sizes = [2, 32], strides = [1, 1]} : vector<2x96xf32> to vector<2x32xf32>
    %187 = arith.addf %185, %186 : vector<2x32xf32>
    %188 = arith.negf %187 : vector<2x32xf32>
    %189 = math.exp %188 : vector<2x32xf32>
    %cst_40 = arith.constant 1.000000e+00 : f32
    %190 = vector.broadcast %cst_40 : f32 to vector<2x32xf32>
    %191 = arith.addf %190, %189 : vector<2x32xf32>
    %192 = arith.divf %190, %191 : vector<2x32xf32>
    %193 = vector.extract_strided_slice %184 {offsets = [0, 32], sizes = [2, 32], strides = [1, 1]} : vector<2x96xf32> to vector<2x32xf32>
    %194 = vector.extract_strided_slice %182 {offsets = [0, 32], sizes = [2, 32], strides = [1, 1]} : vector<2x96xf32> to vector<2x32xf32>
    %195 = arith.addf %193, %194 : vector<2x32xf32>
    %196 = arith.negf %195 : vector<2x32xf32>
    %197 = math.exp %196 : vector<2x32xf32>
    %cst_41 = arith.constant 1.000000e+00 : f32
    %198 = vector.broadcast %cst_41 : f32 to vector<2x32xf32>
    %199 = arith.addf %198, %197 : vector<2x32xf32>
    %200 = arith.divf %198, %199 : vector<2x32xf32>
    %201 = vector.extract_strided_slice %184 {offsets = [0, 64], sizes = [2, 32], strides = [1, 1]} : vector<2x96xf32> to vector<2x32xf32>
    %202 = vector.extract_strided_slice %182 {offsets = [0, 64], sizes = [2, 32], strides = [1, 1]} : vector<2x96xf32> to vector<2x32xf32>
    %203 = arith.addf %202, %6 : vector<2x32xf32>
    %204 = arith.mulf %192, %203 : vector<2x32xf32>
    %205 = arith.addf %201, %204 : vector<2x32xf32>
    %206 = math.tanh %205 : vector<2x32xf32>
    %cst_42 = arith.constant 1.000000e+00 : f32
    %207 = vector.broadcast %cst_42 : f32 to vector<2x32xf32>
    %208 = arith.subf %207, %200 : vector<2x32xf32>
    %209 = arith.mulf %208, %206 : vector<2x32xf32>
    %210 = arith.mulf %200, %178 : vector<2x32xf32>
    %211 = arith.addf %209, %210 : vector<2x32xf32>
    %212 = arith.truncf %211 : vector<2x32xf32> to vector<2x32xbf16>
    %c0_43 = arith.constant 0 : index
    %c160 = arith.constant 160 : index
    %213 = vector.load %arg8[%c0_43, %c160] : memref<2x256xbf16, #tpu.memory_space<vmem>>, vector<2x32xbf16>
    tpu.vector_store %arg8[%c0_43, %c160], %212 {strides = array<i32>} : memref<2x256xbf16, #tpu.memory_space<vmem>>, vector<2x32xbf16>,
    %214 = arith.truncf %211 : vector<2x32xf32> to vector<2x32xbf16>
    %cst_44 = arith.constant dense<0.000000e+00> : vector<2x96xf32>
    %215 = tpu.matmul %214, %3, %cst_44 {dimension_numbers = #tpu.dot_dimension_numbers<[1], [0], [0], [1], [0, 0, 1, 1], [], []>} : vector<2x32xbf16>, vector<32x96xbf16>, vector<2x96xf32> -> vector<2x96xf32>
    %216 = vector.extract_strided_slice %14 {offsets = [0, 6, 0], sizes = [2, 1, 96], strides = [1, 1, 1]} : vector<2x8x96xf32> to vector<2x1x96xf32>
    %217 = vector.shape_cast %216 : vector<2x1x96xf32> to vector<2x96xf32>
    %218 = vector.extract_strided_slice %217 {offsets = [0, 0], sizes = [2, 32], strides = [1, 1]} : vector<2x96xf32> to vector<2x32xf32>
    %219 = vector.extract_strided_slice %215 {offsets = [0, 0], sizes = [2, 32], strides = [1, 1]} : vector<2x96xf32> to vector<2x32xf32>
    %220 = arith.addf %218, %219 : vector<2x32xf32>
    %221 = arith.negf %220 : vector<2x32xf32>
    %222 = math.exp %221 : vector<2x32xf32>
    %cst_45 = arith.constant 1.000000e+00 : f32
    %223 = vector.broadcast %cst_45 : f32 to vector<2x32xf32>
    %224 = arith.addf %223, %222 : vector<2x32xf32>
    %225 = arith.divf %223, %224 : vector<2x32xf32>
    %226 = vector.extract_strided_slice %217 {offsets = [0, 32], sizes = [2, 32], strides = [1, 1]} : vector<2x96xf32> to vector<2x32xf32>
    %227 = vector.extract_strided_slice %215 {offsets = [0, 32], sizes = [2, 32], strides = [1, 1]} : vector<2x96xf32> to vector<2x32xf32>
    %228 = arith.addf %226, %227 : vector<2x32xf32>
    %229 = arith.negf %228 : vector<2x32xf32>
    %230 = math.exp %229 : vector<2x32xf32>
    %cst_46 = arith.constant 1.000000e+00 : f32
    %231 = vector.broadcast %cst_46 : f32 to vector<2x32xf32>
    %232 = arith.addf %231, %230 : vector<2x32xf32>
    %233 = arith.divf %231, %232 : vector<2x32xf32>
    %234 = vector.extract_strided_slice %217 {offsets = [0, 64], sizes = [2, 32], strides = [1, 1]} : vector<2x96xf32> to vector<2x32xf32>
    %235 = vector.extract_strided_slice %215 {offsets = [0, 64], sizes = [2, 32], strides = [1, 1]} : vector<2x96xf32> to vector<2x32xf32>
    %236 = arith.addf %235, %6 : vector<2x32xf32>
    %237 = arith.mulf %225, %236 : vector<2x32xf32>
    %238 = arith.addf %234, %237 : vector<2x32xf32>
    %239 = math.tanh %238 : vector<2x32xf32>
    %cst_47 = arith.constant 1.000000e+00 : f32
    %240 = vector.broadcast %cst_47 : f32 to vector<2x32xf32>
    %241 = arith.subf %240, %233 : vector<2x32xf32>
    %242 = arith.mulf %241, %239 : vector<2x32xf32>
    %243 = arith.mulf %233, %211 : vector<2x32xf32>
    %244 = arith.addf %242, %243 : vector<2x32xf32>
    %245 = arith.truncf %244 : vector<2x32xf32> to vector<2x32xbf16>
    %c0_48 = arith.constant 0 : index
    %c192 = arith.constant 192 : index
    %246 = vector.load %arg8[%c0_48, %c192] : memref<2x256xbf16, #tpu.memory_space<vmem>>, vector<2x32xbf16>
    tpu.vector_store %arg8[%c0_48, %c192], %245 {strides = array<i32>} : memref<2x256xbf16, #tpu.memory_space<vmem>>, vector<2x32xbf16>,
    %247 = arith.truncf %244 : vector<2x32xf32> to vector<2x32xbf16>
    %cst_49 = arith.constant dense<0.000000e+00> : vector<2x96xf32>
    %248 = tpu.matmul %247, %3, %cst_49 {dimension_numbers = #tpu.dot_dimension_numbers<[1], [0], [0], [1], [0, 0, 1, 1], [], []>} : vector<2x32xbf16>, vector<32x96xbf16>, vector<2x96xf32> -> vector<2x96xf32>
    %249 = vector.extract_strided_slice %14 {offsets = [0, 7, 0], sizes = [2, 1, 96], strides = [1, 1, 1]} : vector<2x8x96xf32> to vector<2x1x96xf32>
    %250 = vector.shape_cast %249 : vector<2x1x96xf32> to vector<2x96xf32>
    %251 = vector.extract_strided_slice %250 {offsets = [0, 0], sizes = [2, 32], strides = [1, 1]} : vector<2x96xf32> to vector<2x32xf32>
    %252 = vector.extract_strided_slice %248 {offsets = [0, 0], sizes = [2, 32], strides = [1, 1]} : vector<2x96xf32> to vector<2x32xf32>
    %253 = arith.addf %251, %252 : vector<2x32xf32>
    %254 = arith.negf %253 : vector<2x32xf32>
    %255 = math.exp %254 : vector<2x32xf32>
    %cst_50 = arith.constant 1.000000e+00 : f32
    %256 = vector.broadcast %cst_50 : f32 to vector<2x32xf32>
    %257 = arith.addf %256, %255 : vector<2x32xf32>
    %258 = arith.divf %256, %257 : vector<2x32xf32>
    %259 = vector.extract_strided_slice %250 {offsets = [0, 32], sizes = [2, 32], strides = [1, 1]} : vector<2x96xf32> to vector<2x32xf32>
    %260 = vector.extract_strided_slice %248 {offsets = [0, 32], sizes = [2, 32], strides = [1, 1]} : vector<2x96xf32> to vector<2x32xf32>
    %261 = arith.addf %259, %260 : vector<2x32xf32>
    %262 = arith.negf %261 : vector<2x32xf32>
    %263 = math.exp %262 : vector<2x32xf32>
    %cst_51 = arith.constant 1.000000e+00 : f32
    %264 = vector.broadcast %cst_51 : f32 to vector<2x32xf32>
    %265 = arith.addf %264, %263 : vector<2x32xf32>
    %266 = arith.divf %264, %265 : vector<2x32xf32>
    %267 = vector.extract_strided_slice %250 {offsets = [0, 64], sizes = [2, 32], strides = [1, 1]} : vector<2x96xf32> to vector<2x32xf32>
    %268 = vector.extract_strided_slice %248 {offsets = [0, 64], sizes = [2, 32], strides = [1, 1]} : vector<2x96xf32> to vector<2x32xf32>
    %269 = arith.addf %268, %6 : vector<2x32xf32>
    %270 = arith.mulf %258, %269 : vector<2x32xf32>
    %271 = arith.addf %267, %270 : vector<2x32xf32>
    %272 = math.tanh %271 : vector<2x32xf32>
    %cst_52 = arith.constant 1.000000e+00 : f32
    %273 = vector.broadcast %cst_52 : f32 to vector<2x32xf32>
    %274 = arith.subf %273, %266 : vector<2x32xf32>
    %275 = arith.mulf %274, %272 : vector<2x32xf32>
    %276 = arith.mulf %266, %244 : vector<2x32xf32>
    %277 = arith.addf %275, %276 : vector<2x32xf32>
    %278 = arith.truncf %277 : vector<2x32xf32> to vector<2x32xbf16>
    %c0_53 = arith.constant 0 : index
    %c224 = arith.constant 224 : index
    %279 = vector.load %arg8[%c0_53, %c224] : memref<2x256xbf16, #tpu.memory_space<vmem>>, vector<2x32xbf16>
    tpu.vector_store %arg8[%c0_53, %c224], %278 {strides = array<i32>} : memref<2x256xbf16, #tpu.memory_space<vmem>>, vector<2x32xbf16>,
    %c0_54 = arith.constant 0 : index
    %c0_55 = arith.constant 0 : index
    %280 = vector.load %arg9[%c0_54, %c0_55] : memref<2x32xf32, #tpu.memory_space<vmem>>, vector<2x32xf32>
    tpu.vector_store %arg9[%c0_54, %c0_55], %277 {strides = array<i32>} : memref<2x32xf32, #tpu.memory_space<vmem>>, vector<2x32xf32>,
    return
  }
  func.func @transform_0(%arg0: i32, %arg1: i32) -> (i32, i32, i32) {
    %c0_i32 = arith.constant 0 : i32
    %c0_i32_0 = arith.constant 0 : i32
    return %arg0, %arg1, %c0_i32 : i32, i32, i32
  }
  func.func @transform_1(%arg0: i32, %arg1: i32) -> (i32, i32) {
    %c0_i32 = arith.constant 0 : i32
    %c0_i32_0 = arith.constant 0 : i32
    return %arg0, %c0_i32 : i32, i32
  }
  func.func @transform_2(%arg0: i32, %arg1: i32) -> (i32, i32) {
    %c0_i32 = arith.constant 0 : i32
    %c0_i32_0 = arith.constant 0 : i32
    %c0_i32_1 = arith.constant 0 : i32
    return %c0_i32, %c0_i32_0 : i32, i32
  }
  func.func @transform_3(%arg0: i32, %arg1: i32) -> (i32, i32) {
    %c0_i32 = arith.constant 0 : i32
    %c0_i32_0 = arith.constant 0 : i32
    %c0_i32_1 = arith.constant 0 : i32
    return %c0_i32, %c0_i32_0 : i32, i32
  }
  func.func @transform_4(%arg0: i32, %arg1: i32) -> (i32, i32) {
    %c0_i32 = arith.constant 0 : i32
    %c0_i32_0 = arith.constant 0 : i32
    %c0_i32_1 = arith.constant 0 : i32
    return %c0_i32, %c0_i32_0 : i32, i32
  }
  func.func @transform_5(%arg0: i32, %arg1: i32) -> (i32, i32) {
    %c0_i32 = arith.constant 0 : i32
    %c0_i32_0 = arith.constant 0 : i32
    %c0_i32_1 = arith.constant 0 : i32
    return %c0_i32, %c0_i32_0 : i32, i32
  }
  func.func @transform_6(%arg0: i32, %arg1: i32) -> (i32, i32) {
    %c0_i32 = arith.constant 0 : i32
    return %arg0, %arg1 : i32, i32
  }
  func.func @transform_7(%arg0: i32, %arg1: i32) -> (i32, i32) {
    %c0_i32 = arith.constant 0 : i32
    %c0_i32_0 = arith.constant 0 : i32
    return %arg0, %c0_i32 : i32, i32
  }
}

</mosaic_0001>

<bundles_post_ra>
// kernel: tpu_custom_call.1
= control target key start
LH: loop header
LB: loop body
LE: loop exit
PB: predicated region body
PF: predicated region fallthrough
CT: control target
= control target key end

     0   :  { %13 = vsyncpa [#allocation3], 0  ;;  %s2066_s0 = inlined_call_operand.hbm [shape: bf16[2,8,32], index: 0, kind: input, shape index: {}]   ;;  %s2067_s1 = inlined_call_operand.hbm [shape: f32[2,32], index: 1, kind: input, shape index: {}]   ;;  %s2068_s2 = inlined_call_operand.hbm [shape: bf16[32,96], index: 2, kind: input, shape index: {}]   ;;  %s2069_s3 = inlined_call_operand.hbm [shape: bf16[32,96], index: 3, kind: input, shape index: {}]   ;;  %s2070_s4 = inlined_call_operand.vmem [shape: f32[1,96], index: 4, kind: input, shape index: {}]   ;;  %s2071_s5 = inlined_call_operand.vmem [shape: f32[1,32], index: 5, kind: input, shape index: {}]   ;;  %s2072_s6 = inlined_call_operand.hbm [shape: bf16[2,256], index: 6, kind: output, shape index: {0}]   ;;  %s2073_s7 = inlined_call_operand.hbm [shape: f32[2,32], index: 7, kind: output, shape index: {1}]  }
   0x1   :  { %14 = vsyncpa [#allocation6], 0 }
   0x2   :  { %15 = vsyncpa [#allocation9], 0 }
   0x3   :  { %16 = vsyncpa [#allocation4], 0  ;;  %s36_s26 = sshll.u32 %s2067_s1, 4  ;;  %s37_s26 = int_to_ptr.hbm [resolvable:$true] %s36_s26 }
   0x4   :  { %17 = vsyncpa [#allocation12], 0  ;;  %s1736_s27 = smov [#allocation5]   ;;  %s22_s8 = sshll.u32 %s2066_s0, 4  ;;  %s23_s8 = int_to_ptr.hbm [resolvable:$true] %s22_s8 }
   0x5   :  { %s38_s28 = sshll.u32 %s1736_s27, 4  ;;  %s1737_s9 = smov [#allocation2]   ;;  %s39_s28 = int_to_ptr.vmem [resolvable:$true] %s38_s28 }
   0x6   :  { %41 = dma.hbm_to_vmem [thread:$0]  %s37_s26, 32, %s39_s28, [#allocation6]  }
   0x7   :  { %s24_s10 = sshll.u32 %s1737_s9, 4  ;;  %s1738_s11 = smov 64   ;;  %s25_s10 = int_to_ptr.vmem [resolvable:$true] %s24_s10 }
   0x8   :  { %s1739_s12 = smov 4   ;;  %s46_s14 = sshll.u32 %s2068_s2, 4  ;;  %s47_s14 = int_to_ptr.hbm [resolvable:$true] %s46_s14 }
   0x9   :  { %30 = dma.hbm_to_vmem [thread:$0]  %s23_s8, 128, %s25_s10, [#allocation3], %s1738_s11, %s1738_s11, %s1739_s12  }
   0xa   :  { %s1740_s15 = smov [#allocation7]   ;;  %s59_s18 = sshll.u32 %s2069_s3, 4  ;;  %s60_s18 = int_to_ptr.hbm [resolvable:$true] %s59_s18 }
   0xb   :  { %s48_s16 = sshll.u32 %s1740_s15, 4  ;;  %s1741_s19 = smov [#allocation8]   ;;  %s49_s16 = int_to_ptr.vmem [resolvable:$true] %s48_s16 }
   0xc   :  { %54 = dma.hbm_to_vmem [thread:$0]  %s47_s14, 256, %s49_s16, [#allocation6], %s1738_s11, %s1738_s11, %s1739_s12  }
   0xd   :  { %s61_s20 = sshll.u32 %s1741_s19, 4  ;;  %s62_s20 = int_to_ptr.vmem [resolvable:$true] %s61_s20 }
   0xe   :  { %67 = dma.hbm_to_vmem [thread:$0]  %s60_s18, 256, %s62_s20, [#allocation9], %s1738_s11, %s1738_s11, %s1739_s12  }
   0xf   :  { %1726 = dma.done.wait [#allocation3], 128  }
  0x10   :  { %1727 = vsyncadd [#allocation3], 4294967168 }
  0x11   :  { %1728 = dma.done.wait [#allocation6], 288  }
  0x12   :  { %1729 = vsyncadd [#allocation6], 4294967008 }
  0x13   :  { %1730 = dma.done.wait [#allocation9], 256  }
  0x14   :  { %1731 = vsyncadd [#allocation9], 4294967040  ;;  %vm94_vm0 = vcmask 254976   ;;  %v1473_v0 = vld [vmem:[#allocation7 + $0x8] sm:$0xff]  ;;  %v1470_v1 = vld [vmem:[#allocation8 + $0x8] sm:$0xff]  ;;  %vm130_vm1 = vcmask 261120  }
  0x15   :  { %v1472_v2 = vld [vmem:[#allocation7] sm:$0xff]  ;;  %v1469_v3 = vld [vmem:[#allocation8] sm:$0xff]  ;;  %v93_v4 = vld [vmem:[#allocation5] sm:$0x3]  ;;  %140 = vmatpush.bf16.msra.mxu0 %v1473_v0  ;;  %171 = vmatpush.bf16.msra.mxu1 %v1470_v1  ;;  %vm278_vm10 = vcmask 1040384   ;;  %vm295_vm11 = vcmask 1041409  }
  0x16   :  { %95 = vst.msk [vmem:[#allocation11] sm:$0x3] %vm94_vm0, %v93_v4  ;;  %v1484_v5 = vld [vmem:[%s2071_s5] ss:$0 sm:$0xff]  ;;  %328 = vmatpush.bf16.msra.mxu2 %v1470_v1  ;;  %475 = vmatpush.bf16.msra.mxu3 %v1470_v1  ;;  %v1471_v6 = vld [vmem:[#allocation2] sm:$0xff]  ;;  %s1742_s5 = smov 32  }
  0x17   :  { %222 = vrot.lane.b32.xlu0 %v1484_v5, %s1738_s11  ;;  %v1485_v16 = vld [vmem:[%s2070_s4] ss:$0 sm:$0xff]  ;;  %s1743_s4 = smov 96   ;;  %s1744_s23 = smov [#allocation11]  }
  0x18   :  { %s1391_s24 = sshll.u32 %s1744_s23, 4  ;;  %s1393_s27 = sshll.u32 %s2073_s7, 4  ;;  %s1392_s24 = int_to_ptr.vmem [resolvable:$true] %s1391_s24  ;;  %s1394_s27 = int_to_ptr.hbm [resolvable:$true] %s1393_s27 }
  0x19   :  { %141 = vmatpush.bf16.msra.mxu0 %v1472_v2  ;;  %172 = vmatpush.bf16.msra.mxu1 %v1469_v3  ;;  %s1745_s28 = smov [#allocation10]   ;;  %s1382_s9 = sshll.u32 %s2072_s6, 4  ;;  %s1383_s9 = int_to_ptr.hbm [resolvable:$true] %s1382_s9 }
  0x1a   :  { %329 = vmatpush.bf16.msra.mxu2 %v1469_v3  ;;  %476 = vmatpush.bf16.msra.mxu3 %v1469_v3  ;;  %s1380_s29 = sshll.u32 %s1745_s28, 4  ;;  %s1381_s29 = int_to_ptr.vmem [resolvable:$true] %s1380_s29 }
  0x1c   :  { %1422 = vmatmul.msk.bf16.vlgmr.msra.gmra.mxu0 %vm130_vm1, %v1471_v6 }
  0x1d   :  { %628 = vmatpush.bf16.msrb.mxu0 %v1470_v1  ;;  %781 = vmatpush.bf16.msrb.mxu1 %v1470_v1  ;;  %v1809_v7 = vld [vmem:[#allocation11] sm:$0x3] }
  0x1e   :  { %933 = vmatpush.bf16.msrb.mxu2 %v1470_v1  ;;  %v149_v8 = vpack.c.bf16 %v1809_v7, %v1809_v7  ;;  %1082 = vmatpush.bf16.msrb.mxu3 %v1470_v1  ;;  %v261_v14 = vrot.slane %v1809_v7, 1 }
  0x20   :  { %1431 = vmatmul.msk.bf16.vlgmr.msra.gmra.mxu1 %vm130_vm1, %v149_v8 }
  0x21   :  { %629 = vmatpush.bf16.msrb.mxu0 %v1469_v3  ;;  %782 = vmatpush.bf16.msrb.mxu1 %v1469_v3 }
  0x22   :  { %934 = vmatpush.bf16.msrb.mxu2 %v1469_v3  ;;  %1083 = vmatpush.bf16.msrb.mxu3 %v1469_v3 }
  0x25   :  { %1234 = vmatpush.bf16.msra.mxu0 %v1470_v1 }
  0x29   :  { %1235 = vmatpush.bf16.msra.mxu0 %v1469_v3 }
  0x89   :  { %v1814_v9 = vpop.permute.xlu0 %222 }
  0x99   :  { %v143_v15 = vpop.f32.mrf.mxu0 }
  0x9a   :  { %v1824_v18 = vadd.f32 %v1485_v16, %v143_v15 }
  0x9d   :  { %v174_v10 = vpop.f32.mrf.mxu1 }
  0x9e   :  { %v225_v11 = vadd.f32 %v1814_v9, %v174_v10  ;;  %v179_v20 = vrot.slane %v174_v10, 1  ;;  %v182_v21 = vadd.f32 %v174_v10, %v1824_v18 }
  0xa0   :  { %228 = vrot.lane.b32.xlu1 %v225_v11, %s1738_s11  ;;  %v227_v12 = vrot.slane %v225_v11, 1  ;;  %v1432_v23 = vmul.f32 -1.442695, %v182_v21 }
  0xa1   :  { %v145_v17 = vpop.f32.mrf.mxu0 }
  0xa2   :  { %230 = vrot.lane.b32.xlu0 %v227_v12, %s1738_s11  ;;  %v1826_v19 = vadd.f32 %v1485_v16, %v145_v17  ;;  %1486 = vpow2.f32 %v1432_v23 }
  0xa4   :  { %v183_v22 = vadd.f32 %v179_v20, %v1826_v19 }
  0xa5   :  { %v176_v13 = vpop.f32.mrf.mxu1 }
  0xa6   :  { %v1433_v24 = vmul.f32 -1.442695, %v183_v22 }
  0xa8   :  { %1488 = vpow2.f32 %v1433_v24  ;;  %v1487_v25 = vpop.eup %1486 }
  0xa9   :  { %v190_v27 = vadd.f32 1.0, %v1487_v25 }
  0xaa   :  { %264 = vrot.lane.b32.xlu0 %v261_v14, %s1742_s5 }
  0xab   :  { %1490 = vrcp.f32 %v190_v27  ;;  %v203_v38 = vand.u32 2147483648, %v190_v27  ;;  %vm197_vm4 = vweird.f32 %v190_v27  ;;  %v201_v40 = vand.u32 2147483647, %v190_v27 }
  0xad   :  { %v204_v44 = vor.u32 1.1754944e-38, %v203_v38  ;;  %vm202_vm8 = vcmp.eq.f32.partialorder %v201_v40, 8.507059e+37 }
  0xae   :  { %v1489_v26 = vpop.eup %1488 }
  0xaf   :  { %v191_v28 = vadd.f32 1.0, %v1489_v26 }
  0xb1   :  { %1492 = vrcp.f32 %v191_v28  ;;  %v1491_v29 = vpop.eup %1490  ;;  %v218_v41 = vand.u32 2147483648, %v191_v28  ;;  %vm212_vm6 = vweird.f32 %v191_v28  ;;  %v216_v42 = vand.u32 2147483647, %v191_v28 }
  0xb2   :  { %v193_v31 = vmul.f32 %v1491_v29, %v190_v27  ;;  %vm198_vm2 = vweird.f32 %v1491_v29 }
  0xb3   :  { %vm199_vm5 = vmor %vm197_vm4, %vm198_vm2  ;;  %v219_v47 = vor.u32 1.1754944e-38, %v218_v41  ;;  %vm217_vm9 = vcmp.eq.f32.partialorder %v216_v42, 8.507059e+37 }
  0xb4   :  { %v194_v33 = vsub.f32 1.0, %v193_v31 }
  0xb6   :  { %v195_v35 = vmul.f32 %v1491_v29, %v194_v33 }
  0xb7   :  { %v1493_v30 = vpop.eup %1492 }
  0xb8   :  { %v208_v32 = vmul.f32 %v1493_v30, %v191_v28  ;;  %v196_v37 = vadd.f32 %v1491_v29, %v195_v35  ;;  %vm213_vm3 = vweird.f32 %v1493_v30 }
  0xb9   :  { %vm214_vm7 = vmor %vm212_vm6, %vm213_vm3 }
  0xba   :  { %v209_v34 = vsub.f32 1.0, %v208_v32  ;;  %v200_v43 = vsel %vm199_vm5, %v1491_v29, %v196_v37 }
  0xbb   :  { %v205_v48 = vsel %vm202_vm8, %v204_v44, %v200_v43 }
  0xbc   :  { %v210_v36 = vmul.f32 %v1493_v30, %v209_v34  ;;  %v248_v3 = vsub.f32 1.0, %v205_v48 }
  0xbe   :  { %v211_v39 = vadd.f32 %v1493_v30, %v210_v36 }
  0xc0   :  { %v215_v45 = vsel %vm214_vm7, %v1493_v30, %v211_v39 }
  0xc1   :  { %v220_v51 = vsel %vm217_vm9, %v219_v47, %v215_v45 }
  0xc2   :  { %v249_v60 = vsub.f32 1.0, %v220_v51 }
 0x112   :  { %v229_v46 = vpop.permute.xlu1 %228 }
 0x113   :  { %v234_v49 = vmul.f32 %v229_v46, %v205_v48 }
 0x114   :  { %v231_v50 = vpop.permute.xlu0 %230 }
 0x115   :  { %v235_v52 = vmul.f32 %v231_v50, %v220_v51  ;;  %238 = vrot.lane.b32.xlu2 %v234_v49, %s1738_s11 }
 0x117   :  { %240 = vrot.lane.b32.xlu1 %v235_v52, %s1738_s11 }
 0x11c   :  { %v265_v59 = vpop.permute.xlu0 %264 }
 0x11d   :  { %v269_v62 = vmul.f32 %v265_v59, %v220_v51 }
 0x16f   :  { %v239_v53 = vpop.permute.xlu2 %238 }
 0x170   :  { %v244_v54 = vadd.f32 %v239_v53, %v1824_v18 }
 0x172   :  { %1494 = vtanh.f32 %v244_v54 }
 0x178   :  { %v1495_v55 = vpop.eup %1494 }
 0x179   :  { %252 = vrot.lane.b32.xlu1 %v1495_v55, %s1743_s4 }
 0x189   :  { %v241_v56 = vpop.permute.xlu1 %240 }
 0x18a   :  { %v245_v57 = vadd.f32 %v241_v56, %v1826_v19 }
 0x18c   :  { %1496 = vtanh.f32 %v245_v57 }
 0x192   :  { %v1497_v58 = vpop.eup %1496 }
 0x193   :  { %254 = vrot.lane.b32.xlu2 %v1497_v58, %s1743_s4 }
 0x19b   :  { %262 = vrot.lane.b32.xlu2 %v1809_v7, %s1742_s5 }
 0x1eb   :  { %v253_v2 = vpop.permute.xlu1 %252 }
 0x1ec   :  { %v258_v6 = vmul.f32 %v253_v2, %v248_v3 }
 0x1ed   :  { %v255_v61 = vpop.permute.xlu2 %254 }
 0x1ee   :  { %v259_v63 = vmul.f32 %v255_v61, %v249_v60 }
 0x1f0   :  { %v271_v0 = vadd.f32 %v269_v62, %v259_v63 }
 0x1f2   :  { %v273_v1 = vpack.c.bf16 %v271_v0, %v271_v0  ;;  %v417_v40 = vrot.slane %v271_v0, 7 }
 0x1f4   :  { %v277_v4 = vrot.slane %v273_v1, 3  ;;  %v309_v10 = vunpack.c.l.b16 %v273_v1 }
 0x1f5   :  { %v263_v5 = vpop.permute.xlu2 %262 }
 0x1f6   :  { %v284_v8 = vsel %vm278_vm10, %v273_v1, %v277_v4  ;;  %v268_v11 = vmul.f32 %v263_v5, %v205_v48  ;;  %v1435_v13 = vunpack.i.l.s16 %v309_v10 }
 0x1f7   :  { %289 = vst [vmem:[#allocation1 + $0x20] ss:$4 sm:$0xff] %v284_v8 }
 0x1f8   :  { %v1839_v12 = vadd.f32 %v268_v11, %v258_v6  ;;  %v314_v20 = vrot.slane %v1435_v13, 7 }
 0x1fa   :  { %v272_v7 = vpack.c.bf16 %v1839_v12, %v1839_v12  ;;  %v416_v8 = vrot.slane %v1839_v12, 7 }
 0x1fc   :  { %v276_v14 = vrot.slane %v272_v7, 3  ;;  %v308_v15 = vunpack.c.l.b16 %v272_v7 }
 0x1fe   :  { %v281_v16 = vsel %vm278_vm10, %v272_v7, %v276_v14  ;;  %v1434_v17 = vunpack.i.l.s16 %v308_v15 }
 0x1ff   :  { %285 = vst [vmem:[#allocation1] ss:$4 sm:$0xff] %v281_v16 }
 0x200   :  { %v315_v21 = vsel %vm295_vm11, %v314_v20, %v1434_v17 }
 0x201   :  { %v316_v22 = vpack.c.b16 %v315_v21, %v315_v21 }
 0x203   :  { %317 = vrot.lane.b32.xlu0 %v316_v22, %s1743_s4  ;;  %v1863_v22 = vld [vmem:[#allocation1 + $0x20] sm:$0xf] }
 0x275   :  { %v318_v23 = vpop.permute.xlu0 %317 }
 0x276   :  { %1436 = vmatmul.msk.bf16.vlgmr.msra.gmra.mxu2 %vm130_vm1, %v318_v23 }
 0x2f9   :  { %v331_v24 = vpop.f32.mrf.mxu2 }
 0x2fa   :  { %v340_v25 = vadd.f32 %v331_v24, %v1826_v19  ;;  %v379_v26 = vadd.f32 %v331_v24, %v1814_v9  ;;  %v336_v44 = vrot.slane %v331_v24, 7 }
 0x2fc   :  { %v1438_v27 = vmul.f32 -1.442695, %v340_v25  ;;  %384 = vrot.lane.b32.xlu2 %v379_v26, %s1738_s11  ;;  %v381_v28 = vrot.slane %v379_v26, 7  ;;  %v339_v45 = vadd.f32 %v336_v44, %v1824_v18  ;;  %v1866_v26 = vld [vmem:[#allocation1] sm:$0xf] }
 0x2fe   :  { %1498 = vpow2.f32 %v1438_v27  ;;  %382 = vrot.lane.b32.xlu1 %v381_v28, %s1738_s11  ;;  %v1437_v46 = vmul.f32 -1.442695, %v339_v45 }
 0x301   :  { %v333_v29 = vpop.f32.mrf.mxu2 }
 0x304   :  { %v1499_v30 = vpop.eup %1498 }
 0x305   :  { %v348_v31 = vadd.f32 1.0, %v1499_v30 }
 0x307   :  { %1500 = vrcp.f32 %v348_v31  ;;  %v375_v35 = vand.u32 2147483648, %v348_v31  ;;  %v373_v37 = vand.u32 2147483647, %v348_v31  ;;  %vm369_vm13 = vweird.f32 %v348_v31 }
 0x308   :  { %1502 = vpow2.f32 %v1437_v46 }
 0x309   :  { %v376_v39 = vor.u32 1.1754944e-38, %v375_v35  ;;  %vm374_vm15 = vcmp.eq.f32.partialorder %v373_v37, 8.507059e+37 }
 0x30d   :  { %v1501_v32 = vpop.eup %1500 }
 0x30e   :  { %v365_v33 = vmul.f32 %v1501_v32, %v348_v31  ;;  %vm370_vm12 = vweird.f32 %v1501_v32  ;;  %v1503_v47 = vpop.eup %1502 }
 0x30f   :  { %vm371_vm14 = vmor %vm369_vm13, %vm370_vm12  ;;  %v347_v48 = vadd.f32 1.0, %v1503_v47 }
 0x310   :  { %v366_v34 = vsub.f32 1.0, %v365_v33 }
 0x311   :  { %1504 = vrcp.f32 %v347_v48  ;;  %v360_v56 = vand.u32 2147483648, %v347_v48  ;;  %vm354_vm2 = vweird.f32 %v347_v48  ;;  %v358_v57 = vand.u32 2147483647, %v347_v48 }
 0x312   :  { %v367_v36 = vmul.f32 %v1501_v32, %v366_v34 }
 0x313   :  { %v361_v59 = vor.u32 1.1754944e-38, %v360_v56  ;;  %vm359_vm4 = vcmp.eq.f32.partialorder %v358_v57, 8.507059e+37 }
 0x314   :  { %v368_v38 = vadd.f32 %v1501_v32, %v367_v36 }
 0x316   :  { %v372_v41 = vsel %vm371_vm14, %v1501_v32, %v368_v38 }
 0x317   :  { %v377_v42 = vsel %vm374_vm15, %v376_v39, %v372_v41  ;;  %v1505_v51 = vpop.eup %1504 }
 0x318   :  { %v421_v43 = vmul.f32 %v417_v40, %v377_v42  ;;  %v350_v52 = vmul.f32 %v1505_v51, %v347_v48  ;;  %vm355_vm0 = vweird.f32 %v1505_v51  ;;  %v403_v5 = vsub.f32 1.0, %v377_v42 }
 0x319   :  { %vm356_vm3 = vmor %vm354_vm2, %vm355_vm0 }
 0x31a   :  { %v351_v53 = vsub.f32 1.0, %v350_v52 }
 0x31c   :  { %v352_v54 = vmul.f32 %v1505_v51, %v351_v53 }
 0x31e   :  { %v353_v55 = vadd.f32 %v1505_v51, %v352_v54 }
 0x320   :  { %v357_v58 = vsel %vm356_vm3, %v1505_v51, %v353_v55 }
 0x321   :  { %v362_v61 = vsel %vm359_vm4, %v361_v59, %v357_v58 }
 0x322   :  { %v402_v11 = vsub.f32 1.0, %v362_v61  ;;  %v420_v14 = vmul.f32 %v416_v8, %v362_v61 }
 0x356   :  { %v385_v49 = vpop.permute.xlu2 %384 }
 0x357   :  { %v389_v50 = vmul.f32 %v385_v49, %v377_v42 }
 0x359   :  { %394 = vrot.lane.b32.xlu1 %v389_v50, %s1738_s11 }
 0x370   :  { %v383_v60 = vpop.permute.xlu1 %382 }
 0x371   :  { %v388_v62 = vmul.f32 %v383_v60, %v362_v61 }
 0x373   :  { %392 = vrot.lane.b32.xlu0 %v388_v62, %s1738_s11 }
 0x3cb   :  { %v395_v63 = vpop.permute.xlu1 %394 }
 0x3cc   :  { %v399_v0 = vadd.f32 %v395_v63, %v1826_v19 }
 0x3ce   :  { %1506 = vtanh.f32 %v399_v0 }
 0x3d4   :  { %v1507_v1 = vpop.eup %1506 }
 0x3d5   :  { %408 = vrot.lane.b32.xlu0 %v1507_v1, %s1743_s4 }
 0x3e5   :  { %v393_v2 = vpop.permute.xlu0 %392 }
 0x3e6   :  { %v398_v3 = vadd.f32 %v393_v2, %v1824_v18 }
 0x3e8   :  { %1508 = vtanh.f32 %v398_v3 }
 0x3ee   :  { %v1509_v4 = vpop.eup %1508 }
 0x3ef   :  { %406 = vrot.lane.b32.xlu2 %v1509_v4, %s1743_s4 }
 0x447   :  { %v409_v6 = vpop.permute.xlu0 %408 }
 0x448   :  { %v413_v10 = vmul.f32 %v409_v6, %v403_v5 }
 0x449   :  { %v407_v7 = vpop.permute.xlu2 %406 }
 0x44a   :  { %v1859_v13 = vadd.f32 %v421_v43, %v413_v10  ;;  %v412_v15 = vmul.f32 %v407_v7, %v402_v11 }
 0x44c   :  { %v425_v16 = vpack.c.bf16 %v1859_v13, %v1859_v13  ;;  %v422_v17 = vadd.f32 %v420_v14, %v412_v15 }
 0x44e   :  { %v429_v20 = vrot.slane %v425_v16, 3  ;;  %v424_v21 = vpack.c.bf16 %v422_v17, %v422_v17  ;;  %v456_v24 = vunpack.c.l.b16 %v425_v16  ;;  %v565_v52 = vrot.slane %v422_v17, 7 }
 0x450   :  { %v435_v23 = vsel %vm278_vm10, %v425_v16, %v429_v20  ;;  %v428_v25 = vrot.slane %v424_v21, 3  ;;  %v455_v12 = vunpack.c.l.b16 %v424_v21  ;;  %v1440_v29 = vunpack.i.l.s16 %v456_v24 }
 0x451   :  { %440 = vst [vmem:[#allocation1 + $0x20] ss:$4 sm:$0xff] %v435_v23  ;;  %v566_v23 = vrot.slane %v1859_v13, 7 }
 0x452   :  { %v432_v27 = vsel %vm278_vm10, %v424_v21, %v428_v25  ;;  %v1439_v28 = vunpack.i.l.s16 %v455_v12 }
 0x453   :  { %436 = vst [vmem:[#allocation1] ss:$4 sm:$0xff] %v432_v27 }
 0x454   :  { %v461_v30 = vrot.slane %v1439_v28, 1 }
 0x456   :  { %v462_v31 = vsel %vm295_vm11, %v1440_v29, %v461_v30 }
 0x457   :  { %v463_v32 = vpack.c.b16 %v462_v31, %v462_v31 }
 0x459   :  { %464 = vrot.lane.b32.xlu1 %v463_v32, %s1743_s4 }
 0x45a   :  { %v1894_v13 = vld [vmem:[#allocation1] sm:$0xf] }
 0x4cb   :  { %v465_v33 = vpop.permute.xlu1 %464 }
 0x4cc   :  { %1441 = vmatmul.msk.bf16.vlgmr.msra.gmra.mxu3 %vm130_vm1, %v465_v33 }
 0x54f   :  { %v478_v34 = vpop.f32.mrf.mxu3 }
 0x550   :  { %v483_v35 = vrot.slane %v478_v34, 6  ;;  %v527_v36 = vadd.f32 %v478_v34, %v1814_v9  ;;  %v484_v56 = vrot.slane %v478_v34, 7 }
 0x552   :  { %v487_v37 = vadd.f32 %v483_v35, %v1824_v18  ;;  %v530_v38 = vrot.slane %v527_v36, 7  ;;  %v529_v39 = vrot.slane %v527_v36, 6  ;;  %v488_v57 = vadd.f32 %v484_v56, %v1826_v19  ;;  %v1892_v35 = vld [vmem:[#allocation1 + $0x20] sm:$0xf] }
 0x554   :  { %v1442_v40 = vmul.f32 -1.442695, %v487_v37  ;;  %533 = vrot.lane.b32.xlu0 %v530_v38, %s1738_s11  ;;  %531 = vrot.lane.b32.xlu2 %v529_v39, %s1738_s11  ;;  %v1443_v58 = vmul.f32 -1.442695, %v488_v57 }
 0x556   :  { %1510 = vpow2.f32 %v1442_v40 }
 0x557   :  { %v480_v41 = vpop.f32.mrf.mxu3 }
 0x55c   :  { %v1511_v42 = vpop.eup %1510 }
 0x55d   :  { %v495_v43 = vadd.f32 1.0, %v1511_v42 }
 0x55f   :  { %1512 = vrcp.f32 %v495_v43  ;;  %v508_v47 = vand.u32 2147483648, %v495_v43  ;;  %v506_v49 = vand.u32 2147483647, %v495_v43  ;;  %vm502_vm6 = vweird.f32 %v495_v43 }
 0x560   :  { %1514 = vpow2.f32 %v1443_v58 }
 0x561   :  { %v509_v51 = vor.u32 1.1754944e-38, %v508_v47  ;;  %vm507_vm8 = vcmp.eq.f32.partialorder %v506_v49, 8.507059e+37 }
 0x565   :  { %v1513_v44 = vpop.eup %1512 }
 0x566   :  { %v498_v45 = vmul.f32 %v1513_v44, %v495_v43  ;;  %vm503_vm5 = vweird.f32 %v1513_v44  ;;  %v1515_v59 = vpop.eup %1514 }
 0x567   :  { %vm504_vm7 = vmor %vm502_vm6, %vm503_vm5  ;;  %v496_v60 = vadd.f32 1.0, %v1515_v59 }
 0x568   :  { %v499_v46 = vsub.f32 1.0, %v498_v45 }
 0x569   :  { %1516 = vrcp.f32 %v496_v60  ;;  %v523_v4 = vand.u32 2147483648, %v496_v60  ;;  %vm517_vm12 = vweird.f32 %v496_v60  ;;  %v521_v5 = vand.u32 2147483647, %v496_v60 }
 0x56a   :  { %v500_v48 = vmul.f32 %v1513_v44, %v499_v46 }
 0x56b   :  { %v524_v8 = vor.u32 1.1754944e-38, %v523_v4  ;;  %vm522_vm14 = vcmp.eq.f32.partialorder %v521_v5, 8.507059e+37 }
 0x56c   :  { %v501_v50 = vadd.f32 %v1513_v44, %v500_v48 }
 0x56e   :  { %v505_v53 = vsel %vm504_vm7, %v1513_v44, %v501_v50 }
 0x56f   :  { %v510_v54 = vsel %vm507_vm8, %v509_v51, %v505_v53  ;;  %v1517_v63 = vpop.eup %1516 }
 0x570   :  { %v569_v55 = vmul.f32 %v565_v52, %v510_v54  ;;  %v513_v0 = vmul.f32 %v1517_v63, %v496_v60  ;;  %vm518_vm9 = vweird.f32 %v1517_v63  ;;  %v551_v25 = vsub.f32 1.0, %v510_v54 }
 0x571   :  { %vm519_vm13 = vmor %vm517_vm12, %vm518_vm9 }
 0x572   :  { %v514_v1 = vsub.f32 1.0, %v513_v0 }
 0x574   :  { %v515_v2 = vmul.f32 %v1517_v63, %v514_v1 }
 0x576   :  { %v516_v3 = vadd.f32 %v1517_v63, %v515_v2 }
 0x578   :  { %v520_v6 = vsel %vm519_vm13, %v1517_v63, %v516_v3 }
 0x579   :  { %v525_v11 = vsel %vm522_vm14, %v524_v8, %v520_v6 }
 0x57a   :  { %v552_v24 = vsub.f32 1.0, %v525_v11  ;;  %v570_v28 = vmul.f32 %v566_v23, %v525_v11 }
 0x5ae   :  { %v532_v61 = vpop.permute.xlu2 %531 }
 0x5af   :  { %v537_v62 = vmul.f32 %v532_v61, %v510_v54 }
 0x5b1   :  { %541 = vrot.lane.b32.xlu1 %v537_v62, %s1738_s11 }
 0x5c6   :  { %v534_v10 = vpop.permute.xlu0 %533 }
 0x5c7   :  { %v538_v7 = vmul.f32 %v534_v10, %v525_v11 }
 0x5c9   :  { %543 = vrot.lane.b32.xlu2 %v538_v7, %s1738_s11 }
 0x623   :  { %v544_v14 = vpop.permute.xlu2 %543  ;;  %v542_v15 = vpop.permute.xlu1 %541 }
 0x624   :  { %v548_v16 = vadd.f32 %v544_v14, %v1826_v19  ;;  %v547_v17 = vadd.f32 %v542_v15, %v1824_v18 }
 0x626   :  { %1518 = vtanh.f32 %v548_v16 }
 0x627   :  { %1520 = vtanh.f32 %v547_v17 }
 0x62c   :  { %v1519_v20 = vpop.eup %1518 }
 0x62d   :  { %v1521_v21 = vpop.eup %1520  ;;  %557 = vrot.lane.b32.xlu1 %v1519_v20, %s1743_s4 }
 0x62e   :  { %555 = vrot.lane.b32.xlu0 %v1521_v21, %s1743_s4 }
 0x69f   :  { %v558_v12 = vpop.permute.xlu1 %557 }
 0x6a0   :  { %v556_v27 = vpop.permute.xlu0 %555  ;;  %v562_v29 = vmul.f32 %v558_v12, %v552_v24 }
 0x6a1   :  { %v561_v30 = vmul.f32 %v556_v27, %v551_v25 }
 0x6a2   :  { %v1884_v31 = vadd.f32 %v570_v28, %v562_v29 }
 0x6a3   :  { %v1886_v32 = vadd.f32 %v569_v55, %v561_v30 }
 0x6a4   :  { %v574_v33 = vpack.c.bf16 %v1884_v31, %v1884_v31 }
 0x6a5   :  { %v573_v34 = vpack.c.bf16 %v1886_v32, %v1886_v32 }
 0x6a6   :  { %580 = vst [vmem:[#allocation1 + $0x20] sm:$0xff] %v574_v33  ;;  %v608_v36 = vunpack.c.l.b16 %v574_v33 }
 0x6a7   :  { %576 = vst [vmem:[#allocation1] sm:$0xff] %v573_v34  ;;  %v607_v37 = vunpack.c.l.b16 %v573_v34 }
 0x6a8   :  { %v1445_v38 = vunpack.i.l.s16 %v608_v36 }
 0x6a9   :  { %v1444_v39 = vunpack.i.l.s16 %v607_v37  ;;  %v718_v37 = vrot.slane %v1886_v32, 7 }
 0x6aa   :  { %v614_v40 = vrot.slane %v1445_v38, 1  ;;  %v719_v38 = vrot.slane %v1884_v31, 7 }
 0x6ab   :  { %v613_v41 = vrot.slane %v1444_v39, 2 }
 0x6ad   :  { %v582_v42 = vld [vmem:[#allocation1 + $0x21] ss:$4 sm:$0xff]  ;;  %v615_v43 = vsel %vm295_vm11, %v614_v40, %v613_v41 }
 0x6ae   :  { %v578_v44 = vld [vmem:[#allocation1 + $0x1] ss:$4 sm:$0xff]  ;;  %587 = vst [vmem:[#allocation1 + $0x20] ss:$4 sm:$0xff] %v582_v42  ;;  %v616_v45 = vpack.c.b16 %v615_v43, %v615_v43 }
 0x6af   :  { %583 = vst [vmem:[#allocation1] ss:$4 sm:$0xff] %v578_v44 }
 0x6b0   :  { %617 = vrot.lane.b32.xlu2 %v616_v45, %s1743_s4 }
 0x6b5   :  { %v1918_v31 = vld [vmem:[#allocation1 + $0x20] sm:$0xf] }
 0x70a   :  { %v618_v46 = vpop.permute.xlu2 %617 }
 0x70b   :  { %1446 = vmatmul.msk.bf16.vlgmr.msrb.gmra.mxu0 %vm130_vm1, %v618_v46 }
 0x788   :  { %v631_v47 = vpop.f32.mrf.mxu0 }
 0x789   :  { %v680_v48 = vadd.f32 %v631_v47, %v1814_v9  ;;  %v636_v52 = vrot.slane %v631_v47, 5  ;;  %v637_v53 = vrot.slane %v631_v47, 6 }
 0x78b   :  { %v683_v49 = vrot.slane %v680_v48, 6  ;;  %v682_v50 = vrot.slane %v680_v48, 5  ;;  %v640_v54 = vadd.f32 %v636_v52, %v1824_v18  ;;  %v641_v55 = vadd.f32 %v637_v53, %v1826_v19 }
 0x78d   :  { %686 = vrot.lane.b32.xlu1 %v683_v49, %s1738_s11  ;;  %684 = vrot.lane.b32.xlu0 %v682_v50, %s1738_s11  ;;  %v1447_v56 = vmul.f32 -1.442695, %v640_v54  ;;  %v1448_v57 = vmul.f32 -1.442695, %v641_v55 }
 0x78f   :  { %1522 = vpow2.f32 %v1447_v56 }
 0x790   :  { %v633_v51 = vpop.f32.mrf.mxu0  ;;  %1524 = vpow2.f32 %v1448_v57 }
 0x791   :  { %v1916_v51 = vld [vmem:[#allocation1] sm:$0xf] }
 0x795   :  { %v1523_v58 = vpop.eup %1522 }
 0x796   :  { %v1525_v59 = vpop.eup %1524  ;;  %v648_v60 = vadd.f32 1.0, %v1523_v58 }
 0x797   :  { %v649_v61 = vadd.f32 1.0, %v1525_v59 }
 0x798   :  { %1526 = vrcp.f32 %v648_v60  ;;  %vm655_vm2 = vweird.f32 %v648_v60  ;;  %v661_v11 = vand.u32 2147483648, %v648_v60  ;;  %v659_v14 = vand.u32 2147483647, %v648_v60 }
 0x799   :  { %1528 = vrcp.f32 %v649_v61  ;;  %v676_v10 = vand.u32 2147483648, %v649_v61  ;;  %vm670_vm3 = vweird.f32 %v649_v61  ;;  %v674_v7 = vand.u32 2147483647, %v649_v61 }
 0x79a   :  { %v662_v20 = vor.u32 1.1754944e-38, %v661_v11  ;;  %vm660_vm7 = vcmp.eq.f32.partialorder %v659_v14, 8.507059e+37 }
 0x79b   :  { %v677_v17 = vor.u32 1.1754944e-38, %v676_v10  ;;  %vm675_vm6 = vcmp.eq.f32.partialorder %v674_v7, 8.507059e+37 }
 0x79e   :  { %v1527_v62 = vpop.eup %1526 }
 0x79f   :  { %v1529_v63 = vpop.eup %1528  ;;  %v651_v1 = vmul.f32 %v1527_v62, %v648_v60  ;;  %vm656_vm15 = vweird.f32 %v1527_v62 }
 0x7a0   :  { %v666_v0 = vmul.f32 %v1529_v63, %v649_v61  ;;  %vm671_vm0 = vweird.f32 %v1529_v63  ;;  %vm657_vm4 = vmor %vm655_vm2, %vm656_vm15 }
 0x7a1   :  { %v652_v3 = vsub.f32 1.0, %v651_v1  ;;  %vm672_vm5 = vmor %vm670_vm3, %vm671_vm0 }
 0x7a2   :  { %v667_v2 = vsub.f32 1.0, %v666_v0 }
 0x7a3   :  { %v653_v5 = vmul.f32 %v1527_v62, %v652_v3 }
 0x7a4   :  { %v668_v4 = vmul.f32 %v1529_v63, %v667_v2 }
 0x7a5   :  { %v654_v8 = vadd.f32 %v1527_v62, %v653_v5 }
 0x7a6   :  { %v669_v6 = vadd.f32 %v1529_v63, %v668_v4 }
 0x7a7   :  { %v658_v16 = vsel %vm657_vm4, %v1527_v62, %v654_v8 }
 0x7a8   :  { %v673_v15 = vsel %vm672_vm5, %v1529_v63, %v669_v6  ;;  %v663_v25 = vsel %vm660_vm7, %v662_v20, %v658_v16 }
 0x7a9   :  { %v678_v23 = vsel %vm675_vm6, %v677_v17, %v673_v15  ;;  %v704_v39 = vsub.f32 1.0, %v663_v25  ;;  %v722_v43 = vmul.f32 %v718_v37, %v663_v25 }
 0x7aa   :  { %v705_v40 = vsub.f32 1.0, %v678_v23  ;;  %v723_v45 = vmul.f32 %v719_v38, %v678_v23 }
 0x7ff   :  { %v687_v21 = vpop.permute.xlu1 %686  ;;  %v685_v24 = vpop.permute.xlu0 %684 }
 0x800   :  { %v691_v12 = vmul.f32 %v687_v21, %v678_v23  ;;  %v690_v27 = vmul.f32 %v685_v24, %v663_v25 }
 0x802   :  { %696 = vrot.lane.b32.xlu0 %v691_v12, %s1738_s11  ;;  %694 = vrot.lane.b32.xlu2 %v690_v27, %s1738_s11 }
 0x85c   :  { %v695_v28 = vpop.permute.xlu2 %694 }
 0x85d   :  { %v700_v29 = vadd.f32 %v695_v28, %v1824_v18 }
 0x85f   :  { %1530 = vtanh.f32 %v700_v29 }
 0x865   :  { %v1531_v30 = vpop.eup %1530 }
 0x866   :  { %708 = vrot.lane.b32.xlu1 %v1531_v30, %s1743_s4 }
 0x874   :  { %v697_v33 = vpop.permute.xlu0 %696 }
 0x875   :  { %v701_v34 = vadd.f32 %v697_v33, %v1826_v19 }
 0x877   :  { %1532 = vtanh.f32 %v701_v34 }
 0x87d   :  { %v1533_v36 = vpop.eup %1532 }
 0x87e   :  { %710 = vrot.lane.b32.xlu2 %v1533_v36, %s1743_s4 }
 0x8d8   :  { %v709_v41 = vpop.permute.xlu1 %708  ;;  %v711_v42 = vpop.permute.xlu2 %710 }
 0x8d9   :  { %v714_v44 = vmul.f32 %v709_v41, %v704_v39  ;;  %v715_v46 = vmul.f32 %v711_v42, %v705_v40 }
 0x8db   :  { %v1912_v47 = vadd.f32 %v722_v43, %v714_v44  ;;  %v725_v48 = vadd.f32 %v723_v45, %v715_v46 }
 0x8dd   :  { %v726_v49 = vpack.c.bf16 %v1912_v47, %v1912_v47  ;;  %v727_v50 = vpack.c.bf16 %v725_v48, %v725_v48  ;;  %v872_v21 = vrot.slane %v725_v48, 7 }
 0x8df   :  { %729 = vst [vmem:[#allocation1] sm:$0xff] %v726_v49  ;;  %v760_v32 = vunpack.c.l.b16 %v726_v49  ;;  %v761_v52 = vunpack.c.l.b16 %v727_v50 }
 0x8e0   :  { %733 = vst [vmem:[#allocation1 + $0x20] sm:$0xff] %v727_v50 }
 0x8e1   :  { %v1449_v53 = vunpack.i.l.s16 %v760_v32  ;;  %v1450_v54 = vunpack.i.l.s16 %v761_v52 }
 0x8e3   :  { %v766_v55 = vrot.slane %v1449_v53, 3  ;;  %v767_v56 = vrot.slane %v1450_v54, 2 }
 0x8e5   :  { %v768_v57 = vsel %vm295_vm11, %v767_v56, %v766_v55  ;;  %v871_v55 = vrot.slane %v1912_v47, 7 }
 0x8e6   :  { %v731_v58 = vld [vmem:[#allocation1 + $0x1] ss:$4 sm:$0xff]  ;;  %v769_v59 = vpack.c.b16 %v768_v57, %v768_v57 }
 0x8e7   :  { %736 = vst [vmem:[#allocation1] ss:$4 sm:$0xff] %v731_v58  ;;  %v735_v60 = vld [vmem:[#allocation1 + $0x21] ss:$4 sm:$0xff] }
 0x8e8   :  { %740 = vst [vmem:[#allocation1 + $0x20] ss:$4 sm:$0xff] %v735_v60  ;;  %770 = vrot.lane.b32.xlu0 %v769_v59, %s1743_s4 }
 0x95a   :  { %v771_v61 = vpop.permute.xlu0 %770 }
 0x95b   :  { %1451 = vmatmul.msk.bf16.vlgmr.msrb.gmra.mxu1 %vm130_vm1, %v771_v61 }
 0x9d8   :  { %v784_v62 = vpop.f32.mrf.mxu1 }
 0x9d9   :  { %v790_v63 = vrot.slane %v784_v62, 5  ;;  %v833_v0 = vadd.f32 %v784_v62, %v1814_v9  ;;  %v789_v12 = vrot.slane %v784_v62, 4 }
 0x9db   :  { %v794_v1 = vadd.f32 %v790_v63, %v1826_v19  ;;  %v836_v2 = vrot.slane %v833_v0, 5  ;;  %v835_v3 = vrot.slane %v833_v0, 4  ;;  %v793_v27 = vadd.f32 %v789_v12, %v1824_v18 }
 0x9dd   :  { %v1453_v4 = vmul.f32 -1.442695, %v794_v1  ;;  %839 = vrot.lane.b32.xlu2 %v836_v2, %s1738_s11  ;;  %837 = vrot.lane.b32.xlu1 %v835_v3, %s1738_s11  ;;  %v1452_v28 = vmul.f32 -1.442695, %v793_v27  ;;  %v1939_v3 = vld [vmem:[#allocation1] sm:$0xf] }
 0x9df   :  { %1534 = vpow2.f32 %v1453_v4 }
 0x9e0   :  { %v786_v5 = vpop.f32.mrf.mxu1 }
 0x9e1   :  { %v1941_v5 = vld [vmem:[#allocation1 + $0x20] sm:$0xf] }
 0x9e5   :  { %v1535_v6 = vpop.eup %1534 }
 0x9e6   :  { %v802_v8 = vadd.f32 1.0, %v1535_v6 }
 0x9e8   :  { %1536 = vrcp.f32 %v802_v8  ;;  %v829_v14 = vand.u32 2147483648, %v802_v8  ;;  %v827_v16 = vand.u32 2147483647, %v802_v8  ;;  %vm823_vm9 = vweird.f32 %v802_v8 }
 0x9e9   :  { %1538 = vpow2.f32 %v1452_v28 }
 0x9ea   :  { %v830_v20 = vor.u32 1.1754944e-38, %v829_v14  ;;  %vm828_vm13 = vcmp.eq.f32.partialorder %v827_v16, 8.507059e+37 }
 0x9ee   :  { %v1537_v10 = vpop.eup %1536 }
 0x9ef   :  { %v819_v11 = vmul.f32 %v1537_v10, %v802_v8  ;;  %vm824_vm8 = vweird.f32 %v1537_v10  ;;  %v1539_v29 = vpop.eup %1538 }
 0x9f0   :  { %vm825_vm12 = vmor %vm823_vm9, %vm824_vm8  ;;  %v801_v30 = vadd.f32 1.0, %v1539_v29 }
 0x9f1   :  { %v820_v7 = vsub.f32 1.0, %v819_v11 }
 0x9f2   :  { %1540 = vrcp.f32 %v801_v30  ;;  %v814_v41 = vand.u32 2147483648, %v801_v30  ;;  %vm808_vm15 = vweird.f32 %v801_v30  ;;  %v812_v42 = vand.u32 2147483647, %v801_v30 }
 0x9f3   :  { %v821_v15 = vmul.f32 %v1537_v10, %v820_v7 }
 0x9f4   :  { %v815_v44 = vor.u32 1.1754944e-38, %v814_v41  ;;  %vm813_vm2 = vcmp.eq.f32.partialorder %v812_v42, 8.507059e+37 }
 0x9f5   :  { %v822_v17 = vadd.f32 %v1537_v10, %v821_v15 }
 0x9f7   :  { %v826_v23 = vsel %vm825_vm12, %v1537_v10, %v822_v17 }
 0x9f8   :  { %v831_v24 = vsel %vm828_vm13, %v830_v20, %v826_v23  ;;  %v1541_v36 = vpop.eup %1540 }
 0x9f9   :  { %v876_v25 = vmul.f32 %v872_v21, %v831_v24  ;;  %v804_v37 = vmul.f32 %v1541_v36, %v801_v30  ;;  %vm809_vm14 = vweird.f32 %v1541_v36  ;;  %v858_v57 = vsub.f32 1.0, %v831_v24 }
 0x9fa   :  { %vm810_vm0 = vmor %vm808_vm15, %vm809_vm14 }
 0x9fb   :  { %v805_v38 = vsub.f32 1.0, %v804_v37 }
 0x9fd   :  { %v806_v39 = vmul.f32 %v1541_v36, %v805_v38 }
 0x9ff   :  { %v807_v40 = vadd.f32 %v1541_v36, %v806_v39 }
 0xa01   :  { %v811_v43 = vsel %vm810_vm0, %v1541_v36, %v807_v40 }
 0xa02   :  { %v816_v46 = vsel %vm813_vm2, %v815_v44, %v811_v43 }
 0xa03   :  { %v857_v56 = vsub.f32 1.0, %v816_v46  ;;  %v875_v60 = vmul.f32 %v871_v55, %v816_v46 }
 0xa37   :  { %v840_v33 = vpop.permute.xlu2 %839 }
 0xa38   :  { %v844_v34 = vmul.f32 %v840_v33, %v831_v24 }
 0xa3a   :  { %849 = vrot.lane.b32.xlu1 %v844_v34, %s1738_s11 }
 0xa4f   :  { %v838_v45 = vpop.permute.xlu1 %837 }
 0xa50   :  { %v843_v48 = vmul.f32 %v838_v45, %v816_v46 }
 0xa52   :  { %847 = vrot.lane.b32.xlu0 %v843_v48, %s1738_s11 }
 0xaac   :  { %v850_v49 = vpop.permute.xlu1 %849 }
 0xaad   :  { %v854_v50 = vadd.f32 %v850_v49, %v1826_v19 }
 0xaaf   :  { %1542 = vtanh.f32 %v854_v50 }
 0xab5   :  { %v1543_v32 = vpop.eup %1542 }
 0xab6   :  { %863 = vrot.lane.b32.xlu0 %v1543_v32, %s1743_s4 }
 0xac4   :  { %v848_v52 = vpop.permute.xlu0 %847 }
 0xac5   :  { %v853_v53 = vadd.f32 %v848_v52, %v1824_v18 }
 0xac7   :  { %1544 = vtanh.f32 %v853_v53 }
 0xacd   :  { %v1545_v54 = vpop.eup %1544 }
 0xace   :  { %861 = vrot.lane.b32.xlu2 %v1545_v54, %s1743_s4 }
 0xb28   :  { %v862_v58 = vpop.permute.xlu2 %861  ;;  %v864_v59 = vpop.permute.xlu0 %863 }
 0xb29   :  { %v867_v61 = vmul.f32 %v862_v58, %v857_v56  ;;  %v868_v62 = vmul.f32 %v864_v59, %v858_v57 }
 0xb2b   :  { %v877_v63 = vadd.f32 %v875_v60, %v867_v61  ;;  %v1935_v0 = vadd.f32 %v876_v25, %v868_v62 }
 0xb2d   :  { %v879_v1 = vpack.c.bf16 %v877_v63, %v877_v63  ;;  %v880_v2 = vpack.c.bf16 %v1935_v0, %v1935_v0  ;;  %v1023_v42 = vrot.slane %v877_v63, 7 }
 0xb2f   :  { %882 = vst [vmem:[#allocation1] sm:$0xff] %v879_v1  ;;  %v912_v4 = vunpack.c.l.b16 %v879_v1  ;;  %v913_v47 = vunpack.c.l.b16 %v880_v2 }
 0xb30   :  { %886 = vst [vmem:[#allocation1 + $0x20] sm:$0xff] %v880_v2 }
 0xb31   :  { %v1454_v6 = vunpack.i.l.s16 %v912_v4  ;;  %v1455_v8 = vunpack.i.l.s16 %v913_v47 }
 0xb33   :  { %v918_v10 = vrot.slane %v1454_v6, 4  ;;  %v919_v11 = vrot.slane %v1455_v8, 3 }
 0xb35   :  { %v920_v7 = vsel %vm295_vm11, %v919_v11, %v918_v10 }
 0xb36   :  { %v884_v14 = vld [vmem:[#allocation1 + $0x2] ss:$4 sm:$0xff]  ;;  %v921_v15 = vpack.c.b16 %v920_v7, %v920_v7  ;;  %v1024_v7 = vrot.slane %v1935_v0, 7 }
 0xb37   :  { %889 = vst [vmem:[#allocation1] ss:$4 sm:$0xff] %v884_v14  ;;  %v888_v16 = vld [vmem:[#allocation1 + $0x22] ss:$4 sm:$0xff] }
 0xb38   :  { %893 = vst [vmem:[#allocation1 + $0x20] ss:$4 sm:$0xff] %v888_v16  ;;  %922 = vrot.lane.b32.xlu1 %v921_v15, %s1743_s4 }
 0xb3e   :  { %v1968_v0 = vld [vmem:[#allocation1] sm:$0xf] }
 0xbaa   :  { %v923_v17 = vpop.permute.xlu1 %922 }
 0xbab   :  { %1456 = vmatmul.msk.bf16.vlgmr.msrb.gmra.mxu2 %vm130_vm1, %v923_v17 }
 0xc2e   :  { %v936_v20 = vpop.f32.mrf.mxu2 }
 0xc2f   :  { %v941_v21 = vrot.slane %v936_v20, 3  ;;  %v985_v23 = vadd.f32 %v936_v20, %v1814_v9  ;;  %v942_v46 = vrot.slane %v936_v20, 4 }
 0xc31   :  { %v945_v24 = vadd.f32 %v941_v21, %v1824_v18  ;;  %v988_v25 = vrot.slane %v985_v23, 4  ;;  %v987_v12 = vrot.slane %v985_v23, 3  ;;  %v946_v48 = vadd.f32 %v942_v46, %v1826_v19 }
 0xc33   :  { %v1457_v27 = vmul.f32 -1.442695, %v945_v24  ;;  %991 = vrot.lane.b32.xlu0 %v988_v25, %s1738_s11  ;;  %989 = vrot.lane.b32.xlu2 %v987_v12, %s1738_s11  ;;  %v1458_v49 = vmul.f32 -1.442695, %v946_v48 }
 0xc35   :  { %1546 = vpow2.f32 %v1457_v27 }
 0xc36   :  { %v938_v28 = vpop.f32.mrf.mxu2 }
 0xc37   :  { %v1966_v28 = vld [vmem:[#allocation1 + $0x20] sm:$0xf] }
 0xc3b   :  { %v1547_v29 = vpop.eup %1546 }
 0xc3c   :  { %v953_v30 = vadd.f32 1.0, %v1547_v29 }
 0xc3e   :  { %1548 = vrcp.f32 %v953_v30  ;;  %v966_v37 = vand.u32 2147483648, %v953_v30  ;;  %v964_v39 = vand.u32 2147483647, %v953_v30  ;;  %vm960_vm4 = vweird.f32 %v953_v30 }
 0xc3f   :  { %1550 = vpow2.f32 %v1458_v49 }
 0xc40   :  { %v967_v41 = vor.u32 1.1754944e-38, %v966_v37  ;;  %vm965_vm6 = vcmp.eq.f32.partialorder %v964_v39, 8.507059e+37 }
 0xc44   :  { %v1549_v33 = vpop.eup %1548 }
 0xc45   :  { %v956_v34 = vmul.f32 %v1549_v33, %v953_v30  ;;  %vm961_vm3 = vweird.f32 %v1549_v33  ;;  %v1551_v50 = vpop.eup %1550 }
 0xc46   :  { %vm962_vm5 = vmor %vm960_vm4, %vm961_vm3  ;;  %v954_v32 = vadd.f32 1.0, %v1551_v50 }
 0xc47   :  { %v957_v36 = vsub.f32 1.0, %v956_v34 }
 0xc48   :  { %1552 = vrcp.f32 %v954_v32  ;;  %v981_v59 = vand.u32 2147483648, %v954_v32  ;;  %vm975_vm8 = vweird.f32 %v954_v32  ;;  %v979_v60 = vand.u32 2147483647, %v954_v32 }
 0xc49   :  { %v958_v38 = vmul.f32 %v1549_v33, %v957_v36 }
 0xc4a   :  { %v982_v62 = vor.u32 1.1754944e-38, %v981_v59  ;;  %vm980_vm12 = vcmp.eq.f32.partialorder %v979_v60, 8.507059e+37 }
 0xc4b   :  { %v959_v40 = vadd.f32 %v1549_v33, %v958_v38 }
 0xc4d   :  { %v963_v43 = vsel %vm962_vm5, %v1549_v33, %v959_v40 }
 0xc4e   :  { %v968_v44 = vsel %vm965_vm6, %v967_v41, %v963_v43  ;;  %v1553_v54 = vpop.eup %1552 }
 0xc4f   :  { %v1027_v45 = vmul.f32 %v1023_v42, %v968_v44  ;;  %v971_v55 = vmul.f32 %v1553_v54, %v954_v32  ;;  %vm976_vm7 = vweird.f32 %v1553_v54  ;;  %v1009_v15 = vsub.f32 1.0, %v968_v44 }
 0xc50   :  { %vm977_vm9 = vmor %vm975_vm8, %vm976_vm7 }
 0xc51   :  { %v972_v56 = vsub.f32 1.0, %v971_v55 }
 0xc53   :  { %v973_v57 = vmul.f32 %v1553_v54, %v972_v56 }
 0xc55   :  { %v974_v58 = vadd.f32 %v1553_v54, %v973_v57 }
 0xc57   :  { %v978_v61 = vsel %vm977_vm9, %v1553_v54, %v974_v58 }
 0xc58   :  { %v983_v1 = vsel %vm980_vm12, %v982_v62, %v978_v61 }
 0xc59   :  { %v1010_v14 = vsub.f32 1.0, %v983_v1  ;;  %v1028_v20 = vmul.f32 %v1024_v7, %v983_v1 }
 0xc8d   :  { %v990_v52 = vpop.permute.xlu2 %989 }
 0xc8e   :  { %v995_v53 = vmul.f32 %v990_v52, %v968_v44 }
 0xc90   :  { %999 = vrot.lane.b32.xlu1 %v995_v53, %s1738_s11 }
 0xca5   :  { %v992_v63 = vpop.permute.xlu0 %991 }
 0xca6   :  { %v996_v2 = vmul.f32 %v992_v63, %v983_v1 }
 0xca8   :  { %1001 = vrot.lane.b32.xlu2 %v996_v2, %s1738_s11 }
 0xd02   :  { %v1002_v4 = vpop.permute.xlu2 %1001  ;;  %v1000_v47 = vpop.permute.xlu1 %999 }
 0xd03   :  { %v1006_v6 = vadd.f32 %v1002_v4, %v1826_v19  ;;  %v1005_v8 = vadd.f32 %v1000_v47, %v1824_v18 }
 0xd05   :  { %1554 = vtanh.f32 %v1006_v6 }
 0xd06   :  { %1556 = vtanh.f32 %v1005_v8 }
 0xd0b   :  { %v1555_v10 = vpop.eup %1554 }
 0xd0c   :  { %v1557_v11 = vpop.eup %1556  ;;  %1015 = vrot.lane.b32.xlu1 %v1555_v10, %s1743_s4 }
 0xd0d   :  { %1013 = vrot.lane.b32.xlu0 %v1557_v11, %s1743_s4 }
 0xd7e   :  { %v1016_v16 = vpop.permute.xlu1 %1015 }
 0xd7f   :  { %v1014_v17 = vpop.permute.xlu0 %1013  ;;  %v1020_v21 = vmul.f32 %v1016_v16, %v1010_v14 }
 0xd80   :  { %v1019_v23 = vmul.f32 %v1014_v17, %v1009_v15 }
 0xd81   :  { %v1958_v24 = vadd.f32 %v1028_v20, %v1020_v21 }
 0xd82   :  { %v1960_v25 = vadd.f32 %v1027_v45, %v1019_v23 }
 0xd83   :  { %v1032_v12 = vpack.c.bf16 %v1958_v24, %v1958_v24 }
 0xd84   :  { %v1031_v27 = vpack.c.bf16 %v1960_v25, %v1960_v25 }
 0xd85   :  { %1038 = vst [vmem:[#allocation1 + $0x20] sm:$0xff] %v1032_v12  ;;  %v1062_v29 = vunpack.c.l.b16 %v1032_v12 }
 0xd86   :  { %1034 = vst [vmem:[#allocation1] sm:$0xff] %v1031_v27  ;;  %v1061_v30 = vunpack.c.l.b16 %v1031_v27 }
 0xd87   :  { %v1460_v33 = vunpack.i.l.s16 %v1062_v29 }
 0xd88   :  { %v1459_v34 = vunpack.i.l.s16 %v1061_v30 }
 0xd89   :  { %v1068_v36 = vrot.slane %v1460_v33, 4 }
 0xd8a   :  { %v1067_v37 = vrot.slane %v1459_v34, 5 }
 0xd8c   :  { %v1040_v38 = vld [vmem:[#allocation1 + $0x22] ss:$4 sm:$0xff]  ;;  %v1069_v39 = vsel %vm295_vm11, %v1068_v36, %v1067_v37 }
 0xd8d   :  { %v1036_v40 = vld [vmem:[#allocation1 + $0x2] ss:$4 sm:$0xff]  ;;  %1045 = vst [vmem:[#allocation1 + $0x20] ss:$4 sm:$0xff] %v1040_v38  ;;  %v1070_v41 = vpack.c.b16 %v1069_v39, %v1069_v39  ;;  %v1172_v39 = vrot.slane %v1960_v25, 7 }
 0xd8e   :  { %1041 = vst [vmem:[#allocation1] ss:$4 sm:$0xff] %v1036_v40  ;;  %v1173_v40 = vrot.slane %v1958_v24, 7 }
 0xd8f   :  { %1071 = vrot.lane.b32.xlu2 %v1070_v41, %s1743_s4 }
 0xd94   :  { %v1992_v24 = vld [vmem:[#allocation1 + $0x20] sm:$0xf] }
 0xde9   :  { %v1072_v42 = vpop.permute.xlu2 %1071 }
 0xdea   :  { %1461 = vmatmul.msk.bf16.vlgmr.msrb.gmra.mxu3 %vm130_vm1, %v1072_v42 }
 0xe6d   :  { %v1085_v43 = vpop.f32.mrf.mxu3 }
 0xe6e   :  { %v1134_v44 = vadd.f32 %v1085_v43, %v1814_v9  ;;  %v1090_v49 = vrot.slane %v1085_v43, 2  ;;  %v1091_v50 = vrot.slane %v1085_v43, 3 }
 0xe70   :  { %v1137_v45 = vrot.slane %v1134_v44, 3  ;;  %v1136_v46 = vrot.slane %v1134_v44, 2  ;;  %v1094_v32 = vadd.f32 %v1090_v49, %v1824_v18  ;;  %v1095_v52 = vadd.f32 %v1091_v50, %v1826_v19 }
 0xe72   :  { %1140 = vrot.lane.b32.xlu1 %v1137_v45, %s1738_s11  ;;  %1138 = vrot.lane.b32.xlu0 %v1136_v46, %s1738_s11  ;;  %v1462_v53 = vmul.f32 -1.442695, %v1094_v32  ;;  %v1463_v54 = vmul.f32 -1.442695, %v1095_v52 }
 0xe74   :  { %1558 = vpow2.f32 %v1462_v53 }
 0xe75   :  { %v1087_v48 = vpop.f32.mrf.mxu3  ;;  %1560 = vpow2.f32 %v1463_v54  ;;  %v1990_v54 = vld [vmem:[#allocation1] sm:$0xf] }
 0xe7a   :  { %v1559_v55 = vpop.eup %1558 }
 0xe7b   :  { %v1561_v56 = vpop.eup %1560  ;;  %v1102_v57 = vadd.f32 1.0, %v1559_v55 }
 0xe7c   :  { %v1103_v58 = vadd.f32 1.0, %v1561_v56 }
 0xe7d   :  { %1562 = vrcp.f32 %v1102_v57  ;;  %vm1109_vm15 = vweird.f32 %v1102_v57  ;;  %v1115_v10 = vand.u32 2147483648, %v1102_v57  ;;  %v1113_v7 = vand.u32 2147483647, %v1102_v57 }
 0xe7e   :  { %1564 = vrcp.f32 %v1103_v58  ;;  %v1130_v8 = vand.u32 2147483648, %v1103_v58  ;;  %vm1124_vm0 = vweird.f32 %v1103_v58  ;;  %v1128_v11 = vand.u32 2147483647, %v1103_v58 }
 0xe7f   :  { %v1116_v17 = vor.u32 1.1754944e-38, %v1115_v10  ;;  %vm1114_vm5 = vcmp.eq.f32.partialorder %v1113_v7, 8.507059e+37 }
 0xe80   :  { %v1131_v16 = vor.u32 1.1754944e-38, %v1130_v8  ;;  %vm1129_vm4 = vcmp.eq.f32.partialorder %v1128_v11, 8.507059e+37 }
 0xe83   :  { %v1563_v59 = vpop.eup %1562 }
 0xe84   :  { %v1565_v60 = vpop.eup %1564  ;;  %v1105_v62 = vmul.f32 %v1563_v59, %v1102_v57  ;;  %vm1110_vm13 = vweird.f32 %v1563_v59 }
 0xe85   :  { %v1120_v61 = vmul.f32 %v1565_v60, %v1103_v58  ;;  %vm1125_vm14 = vweird.f32 %v1565_v60  ;;  %vm1111_vm2 = vmor %vm1109_vm15, %vm1110_vm13  ;;  %vm306_vm15 = vcmask 253952  }
 0xe86   :  { %v1106_v1 = vsub.f32 1.0, %v1105_v62  ;;  %vm1126_vm3 = vmor %vm1124_vm0, %vm1125_vm14  ;;  %vm453_vm0 = vcmask 516352  }
 0xe87   :  { %v1121_v63 = vsub.f32 1.0, %v1120_v61 }
 0xe88   :  { %v1107_v4 = vmul.f32 %v1563_v59, %v1106_v1 }
 0xe89   :  { %v1122_v2 = vmul.f32 %v1565_v60, %v1121_v63 }
 0xe8a   :  { %v1108_v6 = vadd.f32 %v1563_v59, %v1107_v4 }
 0xe8b   :  { %v1123_v47 = vadd.f32 %v1565_v60, %v1122_v2 }
 0xe8c   :  { %v1112_v15 = vsel %vm1111_vm2, %v1563_v59, %v1108_v6  ;;  %vm603_vm2 = vcmask 778752  }
 0xe8d   :  { %v1127_v14 = vsel %vm1126_vm3, %v1565_v60, %v1123_v47  ;;  %v1117_v12 = vsel %vm1114_vm5, %v1116_v17, %v1112_v15  ;;  %vm756_vm3 = vcmask 1041152  }
 0xe8e   :  { %v1132_v21 = vsel %vm1129_vm4, %v1131_v16, %v1127_v14  ;;  %v1158_v41 = vsub.f32 1.0, %v1117_v12  ;;  %v1176_v45 = vmul.f32 %v1172_v39, %v1117_v12  ;;  %vm1372_vm4 = vcmask 261127  }
 0xe8f   :  { %v1159_v42 = vsub.f32 1.0, %v1132_v21  ;;  %v1177_v48 = vmul.f32 %v1173_v40, %v1132_v21 }
 0xee4   :  { %v1141_v20 = vpop.permute.xlu1 %1140  ;;  %v1139_v23 = vpop.permute.xlu0 %1138 }
 0xee5   :  { %v1145_v27 = vmul.f32 %v1141_v20, %v1132_v21  ;;  %v1144_v29 = vmul.f32 %v1139_v23, %v1117_v12 }
 0xee7   :  { %1150 = vrot.lane.b32.xlu0 %v1145_v27, %s1738_s11  ;;  %1148 = vrot.lane.b32.xlu2 %v1144_v29, %s1738_s11 }
 0xf41   :  { %v1149_v30 = vpop.permute.xlu2 %1148 }
 0xf42   :  { %v1154_v33 = vadd.f32 %v1149_v30, %v1824_v18 }
 0xf44   :  { %1566 = vtanh.f32 %v1154_v33 }
 0xf4a   :  { %v1567_v34 = vpop.eup %1566 }
 0xf4b   :  { %1162 = vrot.lane.b32.xlu1 %v1567_v34, %s1743_s4 }
 0xf59   :  { %v1151_v36 = vpop.permute.xlu0 %1150 }
 0xf5a   :  { %v1155_v37 = vadd.f32 %v1151_v36, %v1826_v19 }
 0xf5c   :  { %1568 = vtanh.f32 %v1155_v37 }
 0xf62   :  { %v1569_v38 = vpop.eup %1568 }
 0xf63   :  { %1164 = vrot.lane.b32.xlu2 %v1569_v38, %s1743_s4 }
 0xfbd   :  { %v1163_v43 = vpop.permute.xlu1 %1162  ;;  %v1165_v44 = vpop.permute.xlu2 %1164 }
 0xfbe   :  { %v1168_v46 = vmul.f32 %v1163_v43, %v1158_v41  ;;  %v1169_v49 = vmul.f32 %v1165_v44, %v1159_v42  ;;  %v293_v41 = vunpack.c.l.b16 %v1863_v22  ;;  %v292_v42 = vunpack.c.l.b16 %v1866_v26 }
 0xfc0   :  { %v1986_v50 = vadd.f32 %v1176_v45, %v1168_v46  ;;  %v1179_v32 = vadd.f32 %v1177_v48, %v1169_v49  ;;  %v294_v44 = vrot.slane %v293_v41, 7  ;;  %v743_v41 = vunpack.c.l.b16 %v1939_v3 }
 0xfc1   :  { %v1048_v3 = vunpack.c.l.b16 %v1990_v54 }
 0xfc2   :  { %v1180_v52 = vpack.c.bf16 %v1986_v50, %v1986_v50  ;;  %v1181_v53 = vpack.c.bf16 %v1179_v32, %v1179_v32  ;;  %v1325_v29 = vrot.slane %v1179_v32, 7  ;;  %v296_v45 = vsel %vm295_vm11, %v294_v44, %v292_v42 }
 0xfc3   :  { %v745_v44 = vrot.slane %v743_v41, 1 }
 0xfc4   :  { %v1213_v25 = vunpack.c.l.b16 %v1180_v52  ;;  %v1214_v55 = vunpack.c.l.b16 %v1181_v53  ;;  %1183 = vst [vmem:[#allocation1] sm:$0xff] %v1180_v52  ;;  %v297_v52 = vpack.c.b16 %v296_v45, %v296_v45  ;;  %v744_v45 = vunpack.c.l.b16 %v1941_v5 }
 0xfc5   :  { %1187 = vst [vmem:[#allocation1 + $0x20] sm:$0xff] %v1181_v53  ;;  %v1324_v5 = vrot.slane %v1986_v50, 7 }
 0xfc6   :  { %v1464_v56 = vunpack.i.l.s16 %v1213_v25  ;;  %v1465_v57 = vunpack.i.l.s16 %v1214_v55  ;;  %v298_v22 = vrot.slane %v297_v52, 3 }
 0xfc8   :  { %v1219_v58 = vrot.slane %v1464_v56, 6  ;;  %v1220_v59 = vrot.slane %v1465_v57, 5 }
 0xfca   :  { %v1221_v60 = vsel %vm295_vm11, %v1220_v59, %v1219_v58  ;;  %v301_v58 = vsel %vm278_vm10, %v297_v52, %v298_v22  ;;  %v1049_v52 = vunpack.c.l.b16 %v1992_v24 }
 0xfcb   :  { %v1222_v61 = vpack.c.b16 %v1221_v60, %v1221_v60  ;;  %v1185_v62 = vld [vmem:[#allocation1 + $0x3] ss:$4 sm:$0xff] }
 0xfcc   :  { %v1189_v63 = vld [vmem:[#allocation1 + $0x23] ss:$4 sm:$0xff]  ;;  %1190 = vst [vmem:[#allocation1] ss:$4 sm:$0xff] %v1185_v62 }
 0xfcd   :  { %1223 = vrot.lane.b32.xlu0 %v1222_v61, %s1743_s4  ;;  %1194 = vst [vmem:[#allocation1 + $0x20] ss:$4 sm:$0xff] %v1189_v63 }
 0xfd3   :  { %v1191_v53 = vld [vmem:[#allocation1] sm:$0xf] }
 0xfd4   :  { %v1195_v43 = vld [vmem:[#allocation1 + $0x20] sm:$0xf]  ;;  %v1197_v55 = vunpack.c.l.b16 %v1191_v53 }
 0xfd5   :  { %v1198_v46 = vunpack.c.l.b16 %v1195_v43 }
 0xfd7   :  { %v1199_v25 = vrot.slane %v1198_v46, 7 }
 0xfd9   :  { %v1200_v26 = vsel %vm295_vm11, %v1199_v25, %v1197_v55 }
 0xfda   :  { %v1201_v59 = vpack.c.b16 %v1200_v26, %v1200_v26 }
 0xfdc   :  { %v1202_v61 = vrot.slane %v1201_v59, 3 }
 0xfde   :  { %v1205_v63 = vsel %vm278_vm10, %v1201_v59, %v1202_v61 }
0x103f   :  { %v1224_v1 = vpop.permute.xlu0 %1223 }
0x1040   :  { %1466 = vmatmul.msk.bf16.vlgmr.msra.gmra.mxu0 %vm130_vm1, %v1224_v1 }
0x10bd   :  { %v1237_v2 = vpop.f32.mrf.mxu0 }
0x10be   :  { %v1243_v4 = vrot.slane %v1237_v2, 2  ;;  %v1286_v47 = vadd.f32 %v1237_v2, %v1814_v9  ;;  %v1242_v36 = vrot.slane %v1237_v2, 1 }
0x10c0   :  { %v1247_v6 = vadd.f32 %v1243_v4, %v1826_v19  ;;  %v1289_v8 = vrot.slane %v1286_v47, 2  ;;  %v1288_v10 = vrot.slane %v1286_v47, 1  ;;  %v1246_v37 = vadd.f32 %v1242_v36, %v1824_v18 }
0x10c2   :  { %v1468_v11 = vmul.f32 -1.442695, %v1247_v6  ;;  %1292 = vrot.lane.b32.xlu2 %v1289_v8, %s1738_s11  ;;  %1290 = vrot.lane.b32.xlu1 %v1288_v10, %s1738_s11  ;;  %v1467_v38 = vmul.f32 -1.442695, %v1246_v37 }
0x10c4   :  { %1570 = vpow2.f32 %v1468_v11  ;;  %v443_v11 = vunpack.c.l.b16 %v1894_v13 }
0x10c5   :  { %v1239_v7 = vpop.f32.mrf.mxu0 }
0x10c6   :  { %v445_v7 = vrot.slane %v443_v11, 1 }
0x10ca   :  { %v1571_v14 = vpop.eup %1570 }
0x10cb   :  { %v1255_v15 = vadd.f32 1.0, %v1571_v14  ;;  %v444_v14 = vunpack.c.l.b16 %v1892_v35 }
0x10cd   :  { %1572 = vrcp.f32 %v1255_v15  ;;  %v1282_v21 = vand.u32 2147483648, %v1255_v15  ;;  %v1280_v9 = vand.u32 2147483647, %v1255_v15  ;;  %vm1276_vm6 = vweird.f32 %v1255_v15 }
0x10ce   :  { %1574 = vpow2.f32 %v1467_v38 }
0x10cf   :  { %v1283_v27 = vor.u32 1.1754944e-38, %v1282_v21  ;;  %vm1281_vm8 = vcmp.eq.f32.partialorder %v1280_v9, 8.507059e+37  ;;  %v590_v9 = vunpack.c.l.b16 %v1916_v51  ;;  %v897_v51 = vunpack.c.l.b16 %v1966_v28 }
0x10d0   :  { %v746_v28 = vsel %vm295_vm11, %v744_v45, %v745_v44 }
0x10d1   :  { %v898_v38 = vrot.slane %v897_v51, 7 }
0x10d3   :  { %v1573_v16 = vpop.eup %1572 }
0x10d4   :  { %v1272_v17 = vmul.f32 %v1573_v16, %v1255_v15  ;;  %vm1277_vm1 = vweird.f32 %v1573_v16  ;;  %v1575_v39 = vpop.eup %1574  ;;  %v446_v15 = vsel %vm295_vm11, %v444_v14, %v445_v7 }
0x10d5   :  { %vm1278_vm7 = vmor %vm1276_vm6, %vm1277_vm1  ;;  %v1254_v40 = vadd.f32 1.0, %v1575_v39  ;;  %v447_v21 = vpack.c.b16 %v446_v15, %v446_v15  ;;  %v896_v39 = vunpack.c.l.b16 %v1968_v0 }
0x10d6   :  { %v1273_v20 = vsub.f32 1.0, %v1272_v17 }
0x10d7   :  { %1576 = vrcp.f32 %v1254_v40  ;;  %v1267_v1 = vand.u32 2147483648, %v1254_v40  ;;  %vm1261_vm12 = vweird.f32 %v1254_v40  ;;  %v1265_v2 = vand.u32 2147483647, %v1254_v40 }
0x10d8   :  { %v1274_v23 = vmul.f32 %v1573_v16, %v1273_v20 }
0x10d9   :  { %v1268_v47 = vor.u32 1.1754944e-38, %v1267_v1  ;;  %vm1266_vm14 = vcmp.eq.f32.partialorder %v1265_v2, 8.507059e+37 }
0x10da   :  { %v1275_v12 = vadd.f32 %v1573_v16, %v1274_v23 }
0x10dc   :  { %v1279_v30 = vsel %vm1278_vm7, %v1573_v16, %v1275_v12  ;;  %v591_v16 = vunpack.c.l.b16 %v1918_v31  ;;  %v448_v12 = vrot.slane %v447_v21, 3 }
0x10dd   :  { %v2001_v33 = vsel %vm1281_vm8, %v1283_v27, %v1279_v30  ;;  %v1577_v32 = vpop.eup %1576 }
0x10de   :  { %v2004_v34 = vmul.f32 %v1325_v29, %v2001_v33  ;;  %v1257_v56 = vmul.f32 %v1577_v32, %v1254_v40  ;;  %vm1262_vm9 = vweird.f32 %v1577_v32  ;;  %v592_v23 = vrot.slane %v591_v16, 7 }
0x10df   :  { %vm1263_vm13 = vmor %vm1261_vm12, %vm1262_vm9  ;;  %v451_v35 = vsel %vm278_vm10, %v447_v21, %v448_v12  ;;  %v899_v40 = vsel %vm295_vm11, %v898_v38, %v896_v39  ;;  %v1311_v25 = vsub.f32 1.0, %v2001_v33 }
0x10e0   :  { %v1258_v57 = vsub.f32 1.0, %v1257_v56  ;;  %v593_v27 = vsel %vm295_vm11, %v592_v23, %v590_v9  ;;  %v900_v43 = vpack.c.b16 %v899_v40, %v899_v40 }
0x10e1   :  { %v594_v31 = vpack.c.b16 %v593_v27, %v593_v27 }
0x10e2   :  { %v1259_v60 = vmul.f32 %v1577_v32, %v1258_v57  ;;  %v901_v46 = vrot.slane %v900_v43, 3 }
0x10e4   :  { %v1260_v62 = vadd.f32 %v1577_v32, %v1259_v60 }
0x10e6   :  { %v1264_v4 = vsel %vm1263_vm13, %v1577_v32, %v1260_v62  ;;  %v1050_v32 = vrot.slane %v1048_v3, 1 }
0x10e7   :  { %v1269_v8 = vsel %vm1266_vm14, %v1268_v47, %v1264_v4 }
0x10e8   :  { %v1310_v53 = vsub.f32 1.0, %v1269_v8  ;;  %v1051_v55 = vsel %vm295_vm11, %v1049_v52, %v1050_v32  ;;  %v1328_v26 = vmul.f32 %v1324_v5, %v1269_v8 }
0x10e9   :  { %v1052_v59 = vpack.c.b16 %v1051_v55, %v1051_v55 }
0x10eb   :  { %v1053_v50 = vrot.slane %v1052_v59, 3 }
0x10ed   :  { %v1056_v1 = vsel %vm278_vm10, %v1052_v59, %v1053_v50 }
0x111c   :  { %v1293_v48 = vpop.permute.xlu2 %1292 }
0x111d   :  { %v1297_v49 = vmul.f32 %v1293_v48, %v2001_v33  ;;  %v747_v48 = vpack.c.b16 %v746_v28, %v746_v28 }
0x111f   :  { %1302 = vrot.lane.b32.xlu1 %v1297_v49, %s1738_s11  ;;  %v748_v0 = vrot.slane %v747_v48, 3 }
0x1121   :  { %v751_v49 = vsel %vm278_vm10, %v747_v48, %v748_v0 }
0x1127   :  { %303 = vrot.lane.b32.xlu1 %v301_v58, %s1743_s4 }
0x112f   :  { %1207 = vrot.lane.b32.xlu1 %v1205_v63, %s1742_s5 }
0x1134   :  { %v1291_v6 = vpop.permute.xlu1 %1290 }
0x1135   :  { %v1296_v10 = vmul.f32 %v1291_v6, %v1269_v8 }
0x1137   :  { %1300 = vrot.lane.b32.xlu0 %v1296_v10, %s1738_s11 }
0x1191   :  { %v1303_v17 = vpop.permute.xlu1 %1302 }
0x1192   :  { %v1307_v20 = vadd.f32 %v1303_v17, %v1826_v19  ;;  %v595_v19 = vrot.slane %v594_v31, 3 }
0x1194   :  { %1578 = vtanh.f32 %v1307_v20  ;;  %v598_v30 = vsel %vm278_vm10, %v594_v31, %v595_v19 }
0x1199   :  { %v304_v13 = vpop.permute.xlu1 %303 }
0x119a   :  { %v1579_v29 = vpop.eup %1578  ;;  %307 = vst.msk [vmem:[#allocation10] sm:$0x1] %vm306_vm15, %v304_v13 }
0x119b   :  { %454 = vst.msk [vmem:[#allocation10] sm:$0x1] %vm453_vm0, %v451_v35  ;;  %1316 = vrot.lane.b32.xlu0 %v1579_v29, %s1743_s4 }
0x11a1   :  { %v1208_v2 = vpop.permute.xlu1 %1207 }
0x11a3   :  { %600 = vrot.lane.b32.xlu0 %v598_v30, %s1742_s5 }
0x11a9   :  { %v1301_v36 = vpop.permute.xlu0 %1300 }
0x11aa   :  { %v1306_v37 = vadd.f32 %v1301_v36, %v1824_v18  ;;  %v904_v18 = vsel %vm278_vm10, %v900_v43, %v901_v46 }
0x11ac   :  { %1580 = vtanh.f32 %v1306_v37 }
0x11b2   :  { %v1581_v42 = vpop.eup %1580 }
0x11b3   :  { %1314 = vrot.lane.b32.xlu2 %v1581_v42, %s1743_s4 }
0x11bb   :  { %906 = vrot.lane.b32.xlu2 %v904_v18, %s1743_s4 }
0x11c3   :  { %753 = vrot.lane.b32.xlu2 %v751_v49, %s1738_s11 }
0x120d   :  { %v1315_v56 = vpop.permute.xlu2 %1314  ;;  %v1317_v22 = vpop.permute.xlu0 %1316 }
0x120e   :  { %v1320_v57 = vmul.f32 %v1315_v56, %v1310_v53  ;;  %v1321_v58 = vmul.f32 %v1317_v22, %v1311_v25 }
0x1210   :  { %v1330_v60 = vadd.f32 %v1328_v26, %v1320_v57  ;;  %v1331_v61 = vadd.f32 %v2004_v34, %v1321_v58 }
0x1212   :  { %v1332_v54 = vpack.c.bf16 %v1330_v60, %v1330_v60  ;;  %v1333_v62 = vpack.c.bf16 %v1331_v61, %v1331_v61  ;;  %1366 = vrot.lane.b32.xlu1 %v1330_v60, %s1743_s4  ;;  %v1365_v24 = vrot.slane %v1331_v61, 7 }
0x1214   :  { %1335 = vst [vmem:[#allocation1] sm:$0xff] %v1332_v54  ;;  %1368 = vrot.lane.b32.xlu2 %v1365_v24, %s1743_s4 }
0x1215   :  { %1339 = vst [vmem:[#allocation1 + $0x20] sm:$0xff] %v1333_v62  ;;  %v601_v33 = vpop.permute.xlu0 %600  ;;  %v907_v63 = vpop.permute.xlu2 %906 }
0x1216   :  { %604 = vst.msk [vmem:[#allocation10] sm:$0x1] %vm603_vm2, %v601_v33 }
0x1217   :  { %909 = vst.msk [vmem:[#allocation10 + $0x1] sm:$0x1] %vm306_vm15, %v907_v63 }
0x1218   :  { %1058 = vst.msk [vmem:[#allocation10 + $0x1] sm:$0x1] %vm453_vm0, %v1056_v1 }
0x1219   :  { %1210 = vst.msk [vmem:[#allocation10 + $0x1] sm:$0x1] %vm603_vm2, %v1208_v2 }
0x121b   :  { %v1337_v34 = vld [vmem:[#allocation1 + $0x3] ss:$4 sm:$0xff] }
0x121c   :  { %v1341_v4 = vld [vmem:[#allocation1 + $0x23] ss:$4 sm:$0xff]  ;;  %1342 = vst [vmem:[#allocation1] ss:$4 sm:$0xff] %v1337_v34 }
0x121d   :  { %v754_v47 = vpop.permute.xlu2 %753  ;;  %1346 = vst [vmem:[#allocation1 + $0x20] ss:$4 sm:$0xff] %v1341_v4 }
0x121e   :  { %757 = vst.msk [vmem:[#allocation10] sm:$0x1] %vm756_vm3, %v754_v47 }
0x1223   :  { %v1343_v6 = vld [vmem:[#allocation1] sm:$0xf] }
0x1224   :  { %v1347_v8 = vld [vmem:[#allocation1 + $0x20] sm:$0xf]  ;;  %v1349_v10 = vunpack.c.l.b16 %v1343_v6 }
0x1225   :  { %v1350_v11 = vunpack.c.l.b16 %v1347_v8 }
0x1226   :  { %v1351_v7 = vrot.slane %v1349_v10, 1 }
0x1228   :  { %v1352_v14 = vsel %vm295_vm11, %v1350_v11, %v1351_v7 }
0x1229   :  { %v1353_v15 = vpack.c.b16 %v1352_v14, %v1352_v14 }
0x122b   :  { %v1354_v16 = vrot.slane %v1353_v15, 3 }
0x122d   :  { %v1357_v17 = vsel %vm278_vm10, %v1353_v15, %v1354_v16 }
0x122e   :  { %1359 = vrot.lane.b32.xlu0 %v1357_v17, %s1738_s11 }
0x126e   :  { %v1369_v20 = vpop.permute.xlu2 %1368 }
0x126f   :  { %1374 = vst.msk [vmem:[#allocation11 + $0x1] sm:$0x1] %vm306_vm15, %v1369_v20 }
0x1284   :  { %v1367_v21 = vpop.permute.xlu1 %1366 }
0x1285   :  { %1373 = vst.msk [vmem:[#allocation11 - $0x7] sm:$0x80] %vm1372_vm4, %v1367_v21 }
0x1286   :  { %1396 = dma.vmem_to_hbm [thread:$0]  %s1392_s24, 32, %s1394_s27, [#allocation12]  }
0x12a0   :  { %v1360_v23 = vpop.permute.xlu0 %1359 }
0x12a1   :  { %1362 = vst.msk [vmem:[#allocation10 + $0x1] sm:$0x1] %vm756_vm3, %v1360_v23 }
0x12a2   :  { %1385 = dma.vmem_to_hbm [thread:$0]  %s1381_s29, 32, %s1383_s9, [#allocation4]  }
0x12a3   :  { %1732 = dma.done.wait [#allocation4], 32  }
0x12a4   :  { %1733 = vsyncadd [#allocation4], 4294967264 }
0x12a5   :  { %1734 = dma.done.wait [#allocation12], 32  }
0x12a6   :  { %1735 = vsyncadd [#allocation12], 4294967264 }
0x12a7   :  { %1405 = vsyncpa [#allocation3], 1 }
0x12a8   :  { %1406 = vsyncpa [#allocation6], 1 }
0x12a9   :  { %1407 = vsyncpa [#allocation9], 1 }
0x12aa   :  { %1408 = vsyncpa [#allocation4], 1 }
0x12ab   :  { %1409 = vsyncpa [#allocation12], 1 }

</bundles_post_ra>
